<compile_context>
chip_gen: v6e
topology: v6e:2x2x1
jax: 0.10.0
libtpu: 0.0.40
codegen_flags: <defaults>
</compile_context>

<pallas_src>
import math
from functools import partial

import jax
import jax.numpy as jnp
from jax.experimental import pallas as pl
from jax.experimental.pallas import tpu as pltpu

_LN_EPS = 1e-6                    # BERT-pytorch LayerNorm: unbiased std + eps
_GELU_C0 = 0.7978845608028654     # sqrt(2/pi)
_GELU_C1 = 0.044715


def _layer_norm_kernel(z, gamma, beta):
    """Kernel-side BERT LayerNorm: gamma * (x - mean) / (std_unbiased + eps) + beta.

    Uses the EUP approximate reciprocal so the per-row normalization never issues
    a full-width VPU divide.
    """
    h = z.shape[-1]
    mean = jnp.mean(z, axis=-1, keepdims=True)
    var = jnp.sum((z - mean) ** 2, axis=-1, keepdims=True) * (1.0 / (h - 1))
    inv = pl.reciprocal(jnp.sqrt(var) + jnp.float32(_LN_EPS), approx=True)
    return gamma * (z - mean) * inv + beta


def _layer_norm_ref(z, gamma, beta):
    """Pure-JAX LayerNorm used only by the reference implementation."""
    h = z.shape[-1]
    mean = jnp.mean(z, axis=-1, keepdims=True)
    var = jnp.sum((z - mean) ** 2, axis=-1, keepdims=True) * (1.0 / (h - 1))
    return gamma * (z - mean) / (jnp.sqrt(var) + _LN_EPS) + beta


def _attn_sublayer_kernel(x_ref, mask_ref, g1_ref, be1_ref,
                          wq_ref, bq_ref, wk_ref, bk_ref, wv_ref, bv_ref,
                          wo_ref, bo_ref, o_ref, *, num_heads):
    """out = x + MultiHeadAttention(LN1(x), mask) for one batch element.

    1/sqrt(d_k) is already folded into wq_ref / bq_ref by the wrapper.
    """
    x = x_ref[0].astype(jnp.float32)              # (S, H)
    xn = _layer_norm_kernel(x, g1_ref[...], be1_ref[...])
    mask = mask_ref[0]                            # (S, S); > 0 means "attend"
    neg_inf = jnp.float32(-1e9)                   # matches masked_fill(mask==0, -1e9)

    acc = jnp.zeros(x.shape, jnp.float32)
    # Static unroll over heads: each head is a chain of small MXU matmuls.
    for head in range(num_heads):
        qh = jnp.dot(xn, wq_ref[head], preferred_element_type=jnp.float32) + bq_ref[head]
        kh = jnp.dot(xn, wk_ref[head], preferred_element_type=jnp.float32) + bk_ref[head]
        vh = jnp.dot(xn, wv_ref[head], preferred_element_type=jnp.float32) + bv_ref[head]
        # scores = qh @ kh.T without an explicit transpose (contract over d_k).
        scores = jax.lax.dot_general(
            qh, kh, (((1,), (1,)), ((), ())),
            preferred_element_type=jnp.float32)
        scores = jnp.where(mask > 0, scores, neg_inf)
        m = jnp.max(scores, axis=-1, keepdims=True)           # XLU reduce
        p = jnp.exp(scores - m)                                # EUP
        l = jnp.sum(p, axis=-1, keepdims=True)                 # XLU reduce
        ctx = jnp.dot(p, vh, preferred_element_type=jnp.float32)       # (S, d_k)
        # deferred softmax normalization: divide the (S, d_k) context, not (S, S)
        ctx = ctx * pl.reciprocal(l, approx=True)
        # per-head slice of the output projection, accumulated into (S, H)
        acc = acc + jnp.dot(ctx, wo_ref[head], preferred_element_type=jnp.float32)

    o_ref[0] = (x + acc + bo_ref[...]).astype(o_ref.dtype)


def _ffn_sublayer_kernel(a_ref, g2_ref, be2_ref, w1_ref, b1_ref,
                         w2_ref, b2_ref, o_ref):
    """out = a + W2(GELU(W1(LN2(a)))) for one row tile."""
    a = a_ref[...].astype(jnp.float32)            # (tm, H)
    an = _layer_norm_kernel(a, g2_ref[...], be2_ref[...])
    h1 = jnp.dot(an, w1_ref[...], preferred_element_type=jnp.float32) + b1_ref[...]
    gelu = 0.5 * h1 * (1.0 + jnp.tanh(
        jnp.float32(_GELU_C0) * (h1 + jnp.float32(_GELU_C1) * h1 * h1 * h1)))
    ffn = jnp.dot(gelu, w2_ref[...], preferred_element_type=jnp.float32) + b2_ref[...]
    o_ref[...] = (a + ffn).astype(o_ref.dtype)


def _round_up(n, m):
    return ((n + m - 1) // m) * m


def transformer_block(x, mask, params, *, num_heads, tm=256):
    """Forward pass of TransformerBlock (inference / eval mode).

    x:      (B, S, H) activations
    mask:   (B, S, S); mask[b, q, k] > 0  <=>  query q may attend to key k
    params: dict of weights; Linear weights stored as (in, out) (= torch weight.T)
    tm:     FFN row tile (default 256 = MXU height on v6e/v7x; use 128 on v5e)
    """
    b, s, h = x.shape
    d_k = h // num_heads
    f = params["w1"].shape[1]

    # ---- per-head weight layout so the kernel never reshapes / slices lanes ----
    def w_heads(w):                 # (H, H) -> (num_heads, H, d_k)
        return w.reshape(h, num_heads, d_k).transpose(1, 0, 2)

    def b_heads(bvec):              # (H,) -> (num_heads, 1, d_k)
        return bvec.reshape(num_heads, 1, d_k)

    scale = 1.0 / math.sqrt(d_k)
    # Fold the attention scale into the query projection (weight-only fold):
    #   ((xn@Wq + bq) @ K^T) * scale == (xn@(Wq*scale) + bq*scale) @ K^T
    wq3 = w_heads(params["wq"]) * scale
    bq3 = b_heads(params["bq"]) * scale
    wk3, wv3 = w_heads(params["wk"]), w_heads(params["wv"])
    bk3, bv3 = b_heads(params["bk"]), b_heads(params["bv"])
    wo3 = params["wo"].reshape(num_heads, d_k, h)       # rows h*d_k:(h+1)*d_k per head
    bo2 = params["bo"].reshape(1, h)
    g1, be1 = params["ln1_g"].reshape(1, h), params["ln1_b"].reshape(1, h)
    g2, be2 = params["ln2_g"].reshape(1, h), params["ln2_b"].reshape(1, h)
    b1_2, b2_2 = params["b1"].reshape(1, f), params["b2"].reshape(1, h)

    cparams = pltpu.CompilerParams(
        dimension_semantics=("parallel",),
        vmem_limit_bytes=48 * 1024 * 1024,   # explicit budget; < 64 MiB/TC on v7x
    )
    const3 = lambda i: (0, 0, 0)
    const2 = lambda i: (0, 0)

    # ---- sublayer 1: x + dropout(MHA(LN1(x)))  (dropout = identity in eval) ----
    attn_out = pl.pallas_call(
        partial(_attn_sublayer_kernel, num_heads=num_heads),
        out_shape=jax.ShapeDtypeStruct((b, s, h), x.dtype),
        grid_spec=pltpu.PrefetchScalarGridSpec(
            num_scalar_prefetch=0,
            grid=(b,),
            in_specs=[
                pl.BlockSpec((1, s, h), lambda i: (i, 0, 0)),        # x (per batch)
                pl.BlockSpec((1, s, s), lambda i: (i, 0, 0)),        # mask (per batch)
                pl.BlockSpec((1, h), const2),                        # LN1 gamma
                pl.BlockSpec((1, h), const2),                        # LN1 beta
                pl.BlockSpec((num_heads, h, d_k), const3),           # Wq*scale (per head)
                pl.BlockSpec((num_heads, 1, d_k), const3),           # bq*scale
                pl.BlockSpec((num_heads, h, d_k), const3),           # Wk
                pl.BlockSpec((num_heads, 1, d_k), const3),           # bk
                pl.BlockSpec((num_heads, h, d_k), const3),           # Wv
                pl.BlockSpec((num_heads, 1, d_k), const3),           # bv
                pl.BlockSpec((num_heads, d_k, h), const3),           # Wo (per head)
                pl.BlockSpec((1, h), const2),                        # bo
            ],
            out_specs=pl.BlockSpec((1, s, h), lambda i: (i, 0, 0)),
        ),
        compiler_params=cparams,
    )(x, mask, g1, be1, wq3, bq3, wk3, bk3, wv3, bv3, wo3, bo2)

    # ---- sublayer 2: a + dropout(FFN(LN2(a))), row-tiled over B*S --------------
    m_rows = b * s
    tm_eff = min(tm, _round_up(m_rows, 8))    # no assert: pad instead of tiny tiles
    m_pad = _round_up(m_rows, tm_eff)
    a2 = attn_out.reshape(m_rows, h)
    if m_pad != m_rows:
        a2 = jnp.pad(a2, ((0, m_pad - m_rows), (0, 0)))   # zero rows are LN-safe

    out2 = pl.pallas_call(
        _ffn_sublayer_kernel,
        out_shape=jax.ShapeDtypeStruct((m_pad, h), x.dtype),
        grid_spec=pltpu.PrefetchScalarGridSpec(
            num_scalar_prefetch=0,
            grid=(m_pad // tm_eff,),
            in_specs=[
                pl.BlockSpec((tm_eff, h), lambda i: (i, 0)),         # row tile of a
                pl.BlockSpec((1, h), const2),                        # LN2 gamma
                pl.BlockSpec((1, h), const2),                        # LN2 beta
                pl.BlockSpec((h, f), const2),                        # W1 (resident)
                pl.BlockSpec((1, f), const2),                        # b1
                pl.BlockSpec((f, h), const2),                        # W2 (resident)
                pl.BlockSpec((1, h), const2),                        # b2
            ],
            out_specs=pl.BlockSpec((tm_eff, h), lambda i: (i, 0)),
        ),
        compiler_params=cparams,
    )(a2, g2, be2, params["w1"], b1_2, params["w2"], b2_2)

    # TODO(synk): the three nn.Dropout layers are identity here (eval mode);
    # training-mode dropout would need pltpu.prng_seed / prng_random_bits masks.
    return out2[:m_rows].reshape(b, s, h)


def _reference(x, mask, p, num_heads):
    """Pure-JAX reference matching the PyTorch TransformerBlock (eval mode)."""
    b, s, h = x.shape
    d_k = h // num_heads

    xn = _layer_norm_ref(x, p["ln1_g"], p["ln1_b"])

    def heads(z, w, bias):
        return (z @ w + bias).reshape(b, s, num_heads, d_k).transpose(0, 2, 1, 3)

    q = heads(xn, p["wq"], p["bq"])
    k = heads(xn, p["wk"], p["bk"])
    v = heads(xn, p["wv"], p["bv"])
    scores = jnp.einsum("bhqd,bhkd->bhqk", q, k) / jnp.sqrt(jnp.float32(d_k))
    scores = jnp.where(mask[:, None, :, :] > 0, scores, -1e9)
    probs = jax.nn.softmax(scores, axis=-1)
    ctx = jnp.einsum("bhqk,bhkd->bhqd", probs, v).transpose(0, 2, 1, 3).reshape(b, s, h)
    a = x + (ctx @ p["wo"] + p["bo"])

    an = _layer_norm_ref(a, p["ln2_g"], p["ln2_b"])
    h1 = an @ p["w1"] + p["b1"]
    gelu = 0.5 * h1 * (1.0 + jnp.tanh(_GELU_C0 * (h1 + _GELU_C1 * h1 ** 3)))
    return a + (gelu @ p["w2"] + p["b2"])


if __name__ == "__main__":
    B, S, H = 2, 8, 32          # batch, seq, hidden
    NUM_HEADS = 4               # attn_heads
    F = 4 * H                   # feed_forward_hidden = 128

    key = jax.random.PRNGKey(0)
    ks = jax.random.split(key, 14)

    def linear_init(kw, kb, fan_in, fan_out):
        bound = 1.0 / math.sqrt(fan_in)            # nn.Linear default init
        w = jax.random.uniform(kw, (fan_in, fan_out), jnp.float32, -bound, bound)
        bvec = jax.random.uniform(kb, (fan_out,), jnp.float32, -bound, bound)
        return w, bvec

    x = jax.random.normal(ks[0], (B, S, H), jnp.float32)
    wq, bq = linear_init(ks[1], ks[2], H, H)
    wk, bk = linear_init(ks[3], ks[4], H, H)
    wv, bv = linear_init(ks[5], ks[6], H, H)
    wo, bo = linear_init(ks[7], ks[8], H, H)
    w1, b1 = linear_init(ks[9], ks[10], H, F)
    w2, b2 = linear_init(ks[11], ks[12], F, H)

    params = dict(
        ln1_g=jnp.ones((H,), jnp.float32), ln1_b=jnp.zeros((H,), jnp.float32),
        ln2_g=jnp.ones((H,), jnp.float32), ln2_b=jnp.zeros((H,), jnp.float32),
        wq=wq, bq=bq, wk=wk, bk=bk, wv=wv, bv=bv, wo=wo, bo=bo,
        w1=w1, b1=b1, w2=w2, b2=b2,
    )

    # BERT-style padding mask: sequence 0 has 8 valid tokens, sequence 1 has 5.
    lengths = jnp.array([8, 5], jnp.int32)
    key_valid = (jnp.arange(S)[None, :] < lengths[:, None]).astype(jnp.float32)
    mask = jnp.broadcast_to(key_valid[:, None, :], (B, S, S))     # (B, S, S)

    out = transformer_block(x, mask, params, num_heads=NUM_HEADS)
    out = jax.block_until_ready(out)

    ref = _reference(x, mask, params, NUM_HEADS)
    assert out.shape == (B, S, H)
    assert jnp.allclose(out, ref, atol=2e-2, rtol=2e-2), (
        f"max abs err = {jnp.max(jnp.abs(out - ref)):.3e}")
    print("KERNEL_OK")
</pallas_src>

<mosaic_0001>
module attributes {stable_mosaic.version = 11 : i64} {
  func.func @_attn_sublayer_kernel(%arg0: i32, %arg1: memref<1x8x32xf32, #tpu.memory_space<vmem>>, %arg2: memref<1x8x8xf32, #tpu.memory_space<vmem>>, %arg3: memref<1x32xf32, #tpu.memory_space<vmem>>, %arg4: memref<1x32xf32, #tpu.memory_space<vmem>>, %arg5: memref<4x32x8xf32, #tpu.memory_space<vmem>>, %arg6: memref<4x1x8xf32, #tpu.memory_space<vmem>>, %arg7: memref<4x32x8xf32, #tpu.memory_space<vmem>>, %arg8: memref<4x1x8xf32, #tpu.memory_space<vmem>>, %arg9: memref<4x32x8xf32, #tpu.memory_space<vmem>>, %arg10: memref<4x1x8xf32, #tpu.memory_space<vmem>>, %arg11: memref<4x8x32xf32, #tpu.memory_space<vmem>>, %arg12: memref<1x32xf32, #tpu.memory_space<vmem>>, %arg13: memref<1x8x32xf32, #tpu.memory_space<vmem>>) attributes {dimension_semantics = [#tpu.dimension_semantics<parallel>], iteration_bounds = array<i64: 2>, scalar_prefetch = 0 : i64, scratch_operands = 0 : i64, tpu.core_type = #tpu.core_type<tc>, window_params = [{transform_indices = @transform_0, window_bounds = array<i64: 1, 8, 32>}, {transform_indices = @transform_1, window_bounds = array<i64: 1, 8, 8>}, {pipeline_mode = #tpu.pipeline_mode<synchronous>, transform_indices = @transform_2, window_bounds = array<i64: 1, 32>}, {pipeline_mode = #tpu.pipeline_mode<synchronous>, transform_indices = @transform_3, window_bounds = array<i64: 1, 32>}, {pipeline_mode = #tpu.pipeline_mode<synchronous>, transform_indices = @transform_4, window_bounds = array<i64: 4, 32, 8>}, {pipeline_mode = #tpu.pipeline_mode<synchronous>, transform_indices = @transform_5, window_bounds = array<i64: 4, 1, 8>}, {pipeline_mode = #tpu.pipeline_mode<synchronous>, transform_indices = @transform_6, window_bounds = array<i64: 4, 32, 8>}, {pipeline_mode = #tpu.pipeline_mode<synchronous>, transform_indices = @transform_7, window_bounds = array<i64: 4, 1, 8>}, {pipeline_mode = #tpu.pipeline_mode<synchronous>, transform_indices = @transform_8, window_bounds = array<i64: 4, 32, 8>}, {pipeline_mode = #tpu.pipeline_mode<synchronous>, transform_indices = @transform_9, window_bounds = array<i64: 4, 1, 8>}, {pipeline_mode = #tpu.pipeline_mode<synchronous>, transform_indices = @transform_10, window_bounds = array<i64: 4, 8, 32>}, {pipeline_mode = #tpu.pipeline_mode<synchronous>, transform_indices = @transform_11, window_bounds = array<i64: 1, 32>}, {transform_indices = @transform_12, window_bounds = array<i64: 1, 8, 32>}]} {
    %c0 = arith.constant 0 : index
    %c0_0 = arith.constant 0 : index
    %c0_1 = arith.constant 0 : index
    %0 = vector.load %arg1[%c0, %c0_0, %c0_1] : memref<1x8x32xf32, #tpu.memory_space<vmem>>, vector<1x8x32xf32>
    %1 = vector.shape_cast %0 : vector<1x8x32xf32> to vector<8x32xf32>
    %c0_2 = arith.constant 0 : index
    %c0_3 = arith.constant 0 : index
    %2 = vector.load %arg3[%c0_2, %c0_3] : memref<1x32xf32, #tpu.memory_space<vmem>>, vector<1x32xf32>
    %c0_4 = arith.constant 0 : index
    %c0_5 = arith.constant 0 : index
    %3 = vector.load %arg4[%c0_4, %c0_5] : memref<1x32xf32, #tpu.memory_space<vmem>>, vector<1x32xf32>
    %cst = arith.constant dense<0.000000e+00> : vector<8xf32>
    %4 = vector.multi_reduction <add>, %1, %cst [1] : vector<8x32xf32> to vector<8xf32>
    %5 = vector.shape_cast %4 : vector<8xf32> to vector<8x1xf32>
    %cst_6 = arith.constant 3.200000e+01 : f32
    %6 = vector.broadcast %cst_6 : f32 to vector<8x1xf32>
    %7 = arith.divf %5, %6 : vector<8x1xf32>
    %8 = vector.broadcast %7 : vector<8x1xf32> to vector<8x32xf32>
    %9 = arith.subf %1, %8 : vector<8x32xf32>
    %10 = arith.mulf %9, %9 : vector<8x32xf32>
    %cst_7 = arith.constant dense<0.000000e+00> : vector<8xf32>
    %11 = vector.multi_reduction <add>, %10, %cst_7 [1] : vector<8x32xf32> to vector<8xf32>
    %12 = vector.shape_cast %11 : vector<8xf32> to vector<8x1xf32>
    %cst_8 = arith.constant 0.0322580636 : f32
    %13 = vector.broadcast %cst_8 : f32 to vector<8x1xf32>
    %14 = arith.mulf %12, %13 : vector<8x1xf32>
    %15 = math.sqrt %14 : vector<8x1xf32>
    %cst_9 = arith.constant 9.99999997E-7 : f32
    %16 = vector.broadcast %cst_9 : f32 to vector<8x1xf32>
    %17 = arith.addf %15, %16 : vector<8x1xf32>
    %18 = tpu.reciprocal %17 {approx = true} : vector<8x1xf32> -> vector<8x1xf32>
    %19 = vector.broadcast %7 : vector<8x1xf32> to vector<8x32xf32>
    %20 = arith.subf %1, %19 : vector<8x32xf32>
    %21 = vector.broadcast %2 : vector<1x32xf32> to vector<8x32xf32>
    %22 = arith.mulf %21, %20 : vector<8x32xf32>
    %23 = vector.broadcast %18 : vector<8x1xf32> to vector<8x32xf32>
    %24 = arith.mulf %22, %23 : vector<8x32xf32>
    %25 = vector.broadcast %3 : vector<1x32xf32> to vector<8x32xf32>
    %26 = arith.addf %24, %25 : vector<8x32xf32>
    %c0_10 = arith.constant 0 : index
    %c0_11 = arith.constant 0 : index
    %c0_12 = arith.constant 0 : index
    %27 = vector.load %arg2[%c0_10, %c0_11, %c0_12] : memref<1x8x8xf32, #tpu.memory_space<vmem>>, vector<1x8x8xf32>
    %28 = vector.shape_cast %27 : vector<1x8x8xf32> to vector<8x8xf32>
    %cst_13 = arith.constant 0.000000e+00 : f32
    %29 = vector.broadcast %cst_13 : f32 to vector<8x32xf32>
    %c0_14 = arith.constant 0 : index
    %c0_15 = arith.constant 0 : index
    %c0_16 = arith.constant 0 : index
    %30 = vector.load %arg5[%c0_14, %c0_15, %c0_16] : memref<4x32x8xf32, #tpu.memory_space<vmem>>, vector<1x32x8xf32>
    %31 = vector.shape_cast %30 : vector<1x32x8xf32> to vector<32x8xf32>
    %cst_17 = arith.constant dense<0.000000e+00> : vector<8x8xf32>
    %32 = tpu.matmul %26, %31, %cst_17 {dimension_numbers = #tpu.dot_dimension_numbers<[1], [0], [0], [1], [0, 0, 1, 1], [], []>} : vector<8x32xf32>, vector<32x8xf32>, vector<8x8xf32> -> vector<8x8xf32>
    %c0_18 = arith.constant 0 : index
    %c0_19 = arith.constant 0 : index
    %c0_20 = arith.constant 0 : index
    %33 = vector.load %arg6[%c0_18, %c0_19, %c0_20] : memref<4x1x8xf32, #tpu.memory_space<vmem>>, vector<1x1x8xf32>
    %34 = vector.shape_cast %33 : vector<1x1x8xf32> to vector<1x8xf32>
    %35 = vector.broadcast %34 : vector<1x8xf32> to vector<8x8xf32>
    %36 = arith.addf %32, %35 : vector<8x8xf32>
    %c0_21 = arith.constant 0 : index
    %c0_22 = arith.constant 0 : index
    %c0_23 = arith.constant 0 : index
    %37 = vector.load %arg7[%c0_21, %c0_22, %c0_23] : memref<4x32x8xf32, #tpu.memory_space<vmem>>, vector<1x32x8xf32>
    %38 = vector.shape_cast %37 : vector<1x32x8xf32> to vector<32x8xf32>
    %cst_24 = arith.constant dense<0.000000e+00> : vector<8x8xf32>
    %39 = tpu.matmul %26, %38, %cst_24 {dimension_numbers = #tpu.dot_dimension_numbers<[1], [0], [0], [1], [0, 0, 1, 1], [], []>} : vector<8x32xf32>, vector<32x8xf32>, vector<8x8xf32> -> vector<8x8xf32>
    %c0_25 = arith.constant 0 : index
    %c0_26 = arith.constant 0 : index
    %c0_27 = arith.constant 0 : index
    %40 = vector.load %arg8[%c0_25, %c0_26, %c0_27] : memref<4x1x8xf32, #tpu.memory_space<vmem>>, vector<1x1x8xf32>
    %41 = vector.shape_cast %40 : vector<1x1x8xf32> to vector<1x8xf32>
    %42 = vector.broadcast %41 : vector<1x8xf32> to vector<8x8xf32>
    %43 = arith.addf %39, %42 : vector<8x8xf32>
    %c0_28 = arith.constant 0 : index
    %c0_29 = arith.constant 0 : index
    %c0_30 = arith.constant 0 : index
    %44 = vector.load %arg9[%c0_28, %c0_29, %c0_30] : memref<4x32x8xf32, #tpu.memory_space<vmem>>, vector<1x32x8xf32>
    %45 = vector.shape_cast %44 : vector<1x32x8xf32> to vector<32x8xf32>
    %cst_31 = arith.constant dense<0.000000e+00> : vector<8x8xf32>
    %46 = tpu.matmul %26, %45, %cst_31 {dimension_numbers = #tpu.dot_dimension_numbers<[1], [0], [0], [1], [0, 0, 1, 1], [], []>} : vector<8x32xf32>, vector<32x8xf32>, vector<8x8xf32> -> vector<8x8xf32>
    %c0_32 = arith.constant 0 : index
    %c0_33 = arith.constant 0 : index
    %c0_34 = arith.constant 0 : index
    %47 = vector.load %arg10[%c0_32, %c0_33, %c0_34] : memref<4x1x8xf32, #tpu.memory_space<vmem>>, vector<1x1x8xf32>
    %48 = vector.shape_cast %47 : vector<1x1x8xf32> to vector<1x8xf32>
    %49 = vector.broadcast %48 : vector<1x8xf32> to vector<8x8xf32>
    %50 = arith.addf %46, %49 : vector<8x8xf32>
    %cst_35 = arith.constant dense<0.000000e+00> : vector<8x8xf32>
    %51 = tpu.matmul %36, %43, %cst_35 {dimension_numbers = #tpu.dot_dimension_numbers<[1], [1], [0], [0], [0, 0, 1, 0], [], []>} : vector<8x8xf32>, vector<8x8xf32>, vector<8x8xf32> -> vector<8x8xf32>
    %cst_36 = arith.constant 0.000000e+00 : f32
    %52 = vector.broadcast %cst_36 : f32 to vector<8x8xf32>
    %53 = arith.cmpf ogt, %28, %52 : vector<8x8xf32>
    %cst_37 = arith.constant -1.000000e+09 : f32
    %54 = vector.broadcast %cst_37 : f32 to vector<8x8xf32>
    %55 = arith.select %53, %51, %54 : vector<8x8xi1>, vector<8x8xf32>
    %cst_38 = arith.constant dense<0xFF800000> : vector<8xf32>
    %56 = vector.multi_reduction <maximumf>, %55, %cst_38 [1] : vector<8x8xf32> to vector<8xf32>
    %57 = vector.shape_cast %56 : vector<8xf32> to vector<8x1xf32>
    %58 = vector.broadcast %57 : vector<8x1xf32> to vector<8x8xf32>
    %59 = arith.subf %55, %58 : vector<8x8xf32>
    %60 = math.exp %59 : vector<8x8xf32>
    %cst_39 = arith.constant dense<0.000000e+00> : vector<8xf32>
    %61 = vector.multi_reduction <add>, %60, %cst_39 [1] : vector<8x8xf32> to vector<8xf32>
    %62 = vector.shape_cast %61 : vector<8xf32> to vector<8x1xf32>
    %cst_40 = arith.constant dense<0.000000e+00> : vector<8x8xf32>
    %63 = tpu.matmul %60, %50, %cst_40 {dimension_numbers = #tpu.dot_dimension_numbers<[1], [0], [0], [1], [0, 0, 1, 1], [], []>} : vector<8x8xf32>, vector<8x8xf32>, vector<8x8xf32> -> vector<8x8xf32>
    %64 = tpu.reciprocal %62 {approx = true} : vector<8x1xf32> -> vector<8x1xf32>
    %65 = vector.broadcast %64 : vector<8x1xf32> to vector<8x8xf32>
    %66 = arith.mulf %63, %65 : vector<8x8xf32>
    %c0_41 = arith.constant 0 : index
    %c0_42 = arith.constant 0 : index
    %c0_43 = arith.constant 0 : index
    %67 = vector.load %arg11[%c0_41, %c0_42, %c0_43] : memref<4x8x32xf32, #tpu.memory_space<vmem>>, vector<1x8x32xf32>
    %68 = vector.shape_cast %67 : vector<1x8x32xf32> to vector<8x32xf32>
    %cst_44 = arith.constant dense<0.000000e+00> : vector<8x32xf32>
    %69 = tpu.matmul %66, %68, %cst_44 {dimension_numbers = #tpu.dot_dimension_numbers<[1], [0], [0], [1], [0, 0, 1, 1], [], []>} : vector<8x8xf32>, vector<8x32xf32>, vector<8x32xf32> -> vector<8x32xf32>
    %70 = arith.addf %29, %69 : vector<8x32xf32>
    %c1 = arith.constant 1 : index
    %c0_45 = arith.constant 0 : index
    %c0_46 = arith.constant 0 : index
    %71 = vector.load %arg5[%c1, %c0_45, %c0_46] : memref<4x32x8xf32, #tpu.memory_space<vmem>>, vector<1x32x8xf32>
    %72 = vector.shape_cast %71 : vector<1x32x8xf32> to vector<32x8xf32>
    %cst_47 = arith.constant dense<0.000000e+00> : vector<8x8xf32>
    %73 = tpu.matmul %26, %72, %cst_47 {dimension_numbers = #tpu.dot_dimension_numbers<[1], [0], [0], [1], [0, 0, 1, 1], [], []>} : vector<8x32xf32>, vector<32x8xf32>, vector<8x8xf32> -> vector<8x8xf32>
    %c1_48 = arith.constant 1 : index
    %c0_49 = arith.constant 0 : index
    %c0_50 = arith.constant 0 : index
    %74 = vector.load %arg6[%c1_48, %c0_49, %c0_50] : memref<4x1x8xf32, #tpu.memory_space<vmem>>, vector<1x1x8xf32>
    %75 = vector.shape_cast %74 : vector<1x1x8xf32> to vector<1x8xf32>
    %76 = vector.broadcast %75 : vector<1x8xf32> to vector<8x8xf32>
    %77 = arith.addf %73, %76 : vector<8x8xf32>
    %c1_51 = arith.constant 1 : index
    %c0_52 = arith.constant 0 : index
    %c0_53 = arith.constant 0 : index
    %78 = vector.load %arg7[%c1_51, %c0_52, %c0_53] : memref<4x32x8xf32, #tpu.memory_space<vmem>>, vector<1x32x8xf32>
    %79 = vector.shape_cast %78 : vector<1x32x8xf32> to vector<32x8xf32>
    %cst_54 = arith.constant dense<0.000000e+00> : vector<8x8xf32>
    %80 = tpu.matmul %26, %79, %cst_54 {dimension_numbers = #tpu.dot_dimension_numbers<[1], [0], [0], [1], [0, 0, 1, 1], [], []>} : vector<8x32xf32>, vector<32x8xf32>, vector<8x8xf32> -> vector<8x8xf32>
    %c1_55 = arith.constant 1 : index
    %c0_56 = arith.constant 0 : index
    %c0_57 = arith.constant 0 : index
    %81 = vector.load %arg8[%c1_55, %c0_56, %c0_57] : memref<4x1x8xf32, #tpu.memory_space<vmem>>, vector<1x1x8xf32>
    %82 = vector.shape_cast %81 : vector<1x1x8xf32> to vector<1x8xf32>
    %83 = vector.broadcast %82 : vector<1x8xf32> to vector<8x8xf32>
    %84 = arith.addf %80, %83 : vector<8x8xf32>
    %c1_58 = arith.constant 1 : index
    %c0_59 = arith.constant 0 : index
    %c0_60 = arith.constant 0 : index
    %85 = vector.load %arg9[%c1_58, %c0_59, %c0_60] : memref<4x32x8xf32, #tpu.memory_space<vmem>>, vector<1x32x8xf32>
    %86 = vector.shape_cast %85 : vector<1x32x8xf32> to vector<32x8xf32>
    %cst_61 = arith.constant dense<0.000000e+00> : vector<8x8xf32>
    %87 = tpu.matmul %26, %86, %cst_61 {dimension_numbers = #tpu.dot_dimension_numbers<[1], [0], [0], [1], [0, 0, 1, 1], [], []>} : vector<8x32xf32>, vector<32x8xf32>, vector<8x8xf32> -> vector<8x8xf32>
    %c1_62 = arith.constant 1 : index
    %c0_63 = arith.constant 0 : index
    %c0_64 = arith.constant 0 : index
    %88 = vector.load %arg10[%c1_62, %c0_63, %c0_64] : memref<4x1x8xf32, #tpu.memory_space<vmem>>, vector<1x1x8xf32>
    %89 = vector.shape_cast %88 : vector<1x1x8xf32> to vector<1x8xf32>
    %90 = vector.broadcast %89 : vector<1x8xf32> to vector<8x8xf32>
    %91 = arith.addf %87, %90 : vector<8x8xf32>
    %cst_65 = arith.constant dense<0.000000e+00> : vector<8x8xf32>
    %92 = tpu.matmul %77, %84, %cst_65 {dimension_numbers = #tpu.dot_dimension_numbers<[1], [1], [0], [0], [0, 0, 1, 0], [], []>} : vector<8x8xf32>, vector<8x8xf32>, vector<8x8xf32> -> vector<8x8xf32>
    %cst_66 = arith.constant 0.000000e+00 : f32
    %93 = vector.broadcast %cst_66 : f32 to vector<8x8xf32>
    %94 = arith.cmpf ogt, %28, %93 : vector<8x8xf32>
    %cst_67 = arith.constant -1.000000e+09 : f32
    %95 = vector.broadcast %cst_67 : f32 to vector<8x8xf32>
    %96 = arith.select %94, %92, %95 : vector<8x8xi1>, vector<8x8xf32>
    %cst_68 = arith.constant dense<0xFF800000> : vector<8xf32>
    %97 = vector.multi_reduction <maximumf>, %96, %cst_68 [1] : vector<8x8xf32> to vector<8xf32>
    %98 = vector.shape_cast %97 : vector<8xf32> to vector<8x1xf32>
    %99 = vector.broadcast %98 : vector<8x1xf32> to vector<8x8xf32>
    %100 = arith.subf %96, %99 : vector<8x8xf32>
    %101 = math.exp %100 : vector<8x8xf32>
    %cst_69 = arith.constant dense<0.000000e+00> : vector<8xf32>
    %102 = vector.multi_reduction <add>, %101, %cst_69 [1] : vector<8x8xf32> to vector<8xf32>
    %103 = vector.shape_cast %102 : vector<8xf32> to vector<8x1xf32>
    %cst_70 = arith.constant dense<0.000000e+00> : vector<8x8xf32>
    %104 = tpu.matmul %101, %91, %cst_70 {dimension_numbers = #tpu.dot_dimension_numbers<[1], [0], [0], [1], [0, 0, 1, 1], [], []>} : vector<8x8xf32>, vector<8x8xf32>, vector<8x8xf32> -> vector<8x8xf32>
    %105 = tpu.reciprocal %103 {approx = true} : vector<8x1xf32> -> vector<8x1xf32>
    %106 = vector.broadcast %105 : vector<8x1xf32> to vector<8x8xf32>
    %107 = arith.mulf %104, %106 : vector<8x8xf32>
    %c1_71 = arith.constant 1 : index
    %c0_72 = arith.constant 0 : index
    %c0_73 = arith.constant 0 : index
    %108 = vector.load %arg11[%c1_71, %c0_72, %c0_73] : memref<4x8x32xf32, #tpu.memory_space<vmem>>, vector<1x8x32xf32>
    %109 = vector.shape_cast %108 : vector<1x8x32xf32> to vector<8x32xf32>
    %cst_74 = arith.constant dense<0.000000e+00> : vector<8x32xf32>
    %110 = tpu.matmul %107, %109, %cst_74 {dimension_numbers = #tpu.dot_dimension_numbers<[1], [0], [0], [1], [0, 0, 1, 1], [], []>} : vector<8x8xf32>, vector<8x32xf32>, vector<8x32xf32> -> vector<8x32xf32>
    %111 = arith.addf %70, %110 : vector<8x32xf32>
    %c2 = arith.constant 2 : index
    %c0_75 = arith.constant 0 : index
    %c0_76 = arith.constant 0 : index
    %112 = vector.load %arg5[%c2, %c0_75, %c0_76] : memref<4x32x8xf32, #tpu.memory_space<vmem>>, vector<1x32x8xf32>
    %113 = vector.shape_cast %112 : vector<1x32x8xf32> to vector<32x8xf32>
    %cst_77 = arith.constant dense<0.000000e+00> : vector<8x8xf32>
    %114 = tpu.matmul %26, %113, %cst_77 {dimension_numbers = #tpu.dot_dimension_numbers<[1], [0], [0], [1], [0, 0, 1, 1], [], []>} : vector<8x32xf32>, vector<32x8xf32>, vector<8x8xf32> -> vector<8x8xf32>
    %c2_78 = arith.constant 2 : index
    %c0_79 = arith.constant 0 : index
    %c0_80 = arith.constant 0 : index
    %115 = vector.load %arg6[%c2_78, %c0_79, %c0_80] : memref<4x1x8xf32, #tpu.memory_space<vmem>>, vector<1x1x8xf32>
    %116 = vector.shape_cast %115 : vector<1x1x8xf32> to vector<1x8xf32>
    %117 = vector.broadcast %116 : vector<1x8xf32> to vector<8x8xf32>
    %118 = arith.addf %114, %117 : vector<8x8xf32>
    %c2_81 = arith.constant 2 : index
    %c0_82 = arith.constant 0 : index
    %c0_83 = arith.constant 0 : index
    %119 = vector.load %arg7[%c2_81, %c0_82, %c0_83] : memref<4x32x8xf32, #tpu.memory_space<vmem>>, vector<1x32x8xf32>
    %120 = vector.shape_cast %119 : vector<1x32x8xf32> to vector<32x8xf32>
    %cst_84 = arith.constant dense<0.000000e+00> : vector<8x8xf32>
    %121 = tpu.matmul %26, %120, %cst_84 {dimension_numbers = #tpu.dot_dimension_numbers<[1], [0], [0], [1], [0, 0, 1, 1], [], []>} : vector<8x32xf32>, vector<32x8xf32>, vector<8x8xf32> -> vector<8x8xf32>
    %c2_85 = arith.constant 2 : index
    %c0_86 = arith.constant 0 : index
    %c0_87 = arith.constant 0 : index
    %122 = vector.load %arg8[%c2_85, %c0_86, %c0_87] : memref<4x1x8xf32, #tpu.memory_space<vmem>>, vector<1x1x8xf32>
    %123 = vector.shape_cast %122 : vector<1x1x8xf32> to vector<1x8xf32>
    %124 = vector.broadcast %123 : vector<1x8xf32> to vector<8x8xf32>
    %125 = arith.addf %121, %124 : vector<8x8xf32>
    %c2_88 = arith.constant 2 : index
    %c0_89 = arith.constant 0 : index
    %c0_90 = arith.constant 0 : index
    %126 = vector.load %arg9[%c2_88, %c0_89, %c0_90] : memref<4x32x8xf32, #tpu.memory_space<vmem>>, vector<1x32x8xf32>
    %127 = vector.shape_cast %126 : vector<1x32x8xf32> to vector<32x8xf32>
    %cst_91 = arith.constant dense<0.000000e+00> : vector<8x8xf32>
    %128 = tpu.matmul %26, %127, %cst_91 {dimension_numbers = #tpu.dot_dimension_numbers<[1], [0], [0], [1], [0, 0, 1, 1], [], []>} : vector<8x32xf32>, vector<32x8xf32>, vector<8x8xf32> -> vector<8x8xf32>
    %c2_92 = arith.constant 2 : index
    %c0_93 = arith.constant 0 : index
    %c0_94 = arith.constant 0 : index
    %129 = vector.load %arg10[%c2_92, %c0_93, %c0_94] : memref<4x1x8xf32, #tpu.memory_space<vmem>>, vector<1x1x8xf32>
    %130 = vector.shape_cast %129 : vector<1x1x8xf32> to vector<1x8xf32>
    %131 = vector.broadcast %130 : vector<1x8xf32> to vector<8x8xf32>
    %132 = arith.addf %128, %131 : vector<8x8xf32>
    %cst_95 = arith.constant dense<0.000000e+00> : vector<8x8xf32>
    %133 = tpu.matmul %118, %125, %cst_95 {dimension_numbers = #tpu.dot_dimension_numbers<[1], [1], [0], [0], [0, 0, 1, 0], [], []>} : vector<8x8xf32>, vector<8x8xf32>, vector<8x8xf32> -> vector<8x8xf32>
    %cst_96 = arith.constant 0.000000e+00 : f32
    %134 = vector.broadcast %cst_96 : f32 to vector<8x8xf32>
    %135 = arith.cmpf ogt, %28, %134 : vector<8x8xf32>
    %cst_97 = arith.constant -1.000000e+09 : f32
    %136 = vector.broadcast %cst_97 : f32 to vector<8x8xf32>
    %137 = arith.select %135, %133, %136 : vector<8x8xi1>, vector<8x8xf32>
    %cst_98 = arith.constant dense<0xFF800000> : vector<8xf32>
    %138 = vector.multi_reduction <maximumf>, %137, %cst_98 [1] : vector<8x8xf32> to vector<8xf32>
    %139 = vector.shape_cast %138 : vector<8xf32> to vector<8x1xf32>
    %140 = vector.broadcast %139 : vector<8x1xf32> to vector<8x8xf32>
    %141 = arith.subf %137, %140 : vector<8x8xf32>
    %142 = math.exp %141 : vector<8x8xf32>
    %cst_99 = arith.constant dense<0.000000e+00> : vector<8xf32>
    %143 = vector.multi_reduction <add>, %142, %cst_99 [1] : vector<8x8xf32> to vector<8xf32>
    %144 = vector.shape_cast %143 : vector<8xf32> to vector<8x1xf32>
    %cst_100 = arith.constant dense<0.000000e+00> : vector<8x8xf32>
    %145 = tpu.matmul %142, %132, %cst_100 {dimension_numbers = #tpu.dot_dimension_numbers<[1], [0], [0], [1], [0, 0, 1, 1], [], []>} : vector<8x8xf32>, vector<8x8xf32>, vector<8x8xf32> -> vector<8x8xf32>
    %146 = tpu.reciprocal %144 {approx = true} : vector<8x1xf32> -> vector<8x1xf32>
    %147 = vector.broadcast %146 : vector<8x1xf32> to vector<8x8xf32>
    %148 = arith.mulf %145, %147 : vector<8x8xf32>
    %c2_101 = arith.constant 2 : index
    %c0_102 = arith.constant 0 : index
    %c0_103 = arith.constant 0 : index
    %149 = vector.load %arg11[%c2_101, %c0_102, %c0_103] : memref<4x8x32xf32, #tpu.memory_space<vmem>>, vector<1x8x32xf32>
    %150 = vector.shape_cast %149 : vector<1x8x32xf32> to vector<8x32xf32>
    %cst_104 = arith.constant dense<0.000000e+00> : vector<8x32xf32>
    %151 = tpu.matmul %148, %150, %cst_104 {dimension_numbers = #tpu.dot_dimension_numbers<[1], [0], [0], [1], [0, 0, 1, 1], [], []>} : vector<8x8xf32>, vector<8x32xf32>, vector<8x32xf32> -> vector<8x32xf32>
    %152 = arith.addf %111, %151 : vector<8x32xf32>
    %c3 = arith.constant 3 : index
    %c0_105 = arith.constant 0 : index
    %c0_106 = arith.constant 0 : index
    %153 = vector.load %arg5[%c3, %c0_105, %c0_106] : memref<4x32x8xf32, #tpu.memory_space<vmem>>, vector<1x32x8xf32>
    %154 = vector.shape_cast %153 : vector<1x32x8xf32> to vector<32x8xf32>
    %cst_107 = arith.constant dense<0.000000e+00> : vector<8x8xf32>
    %155 = tpu.matmul %26, %154, %cst_107 {dimension_numbers = #tpu.dot_dimension_numbers<[1], [0], [0], [1], [0, 0, 1, 1], [], []>} : vector<8x32xf32>, vector<32x8xf32>, vector<8x8xf32> -> vector<8x8xf32>
    %c3_108 = arith.constant 3 : index
    %c0_109 = arith.constant 0 : index
    %c0_110 = arith.constant 0 : index
    %156 = vector.load %arg6[%c3_108, %c0_109, %c0_110] : memref<4x1x8xf32, #tpu.memory_space<vmem>>, vector<1x1x8xf32>
    %157 = vector.shape_cast %156 : vector<1x1x8xf32> to vector<1x8xf32>
    %158 = vector.broadcast %157 : vector<1x8xf32> to vector<8x8xf32>
    %159 = arith.addf %155, %158 : vector<8x8xf32>
    %c3_111 = arith.constant 3 : index
    %c0_112 = arith.constant 0 : index
    %c0_113 = arith.constant 0 : index
    %160 = vector.load %arg7[%c3_111, %c0_112, %c0_113] : memref<4x32x8xf32, #tpu.memory_space<vmem>>, vector<1x32x8xf32>
    %161 = vector.shape_cast %160 : vector<1x32x8xf32> to vector<32x8xf32>
    %cst_114 = arith.constant dense<0.000000e+00> : vector<8x8xf32>
    %162 = tpu.matmul %26, %161, %cst_114 {dimension_numbers = #tpu.dot_dimension_numbers<[1], [0], [0], [1], [0, 0, 1, 1], [], []>} : vector<8x32xf32>, vector<32x8xf32>, vector<8x8xf32> -> vector<8x8xf32>
    %c3_115 = arith.constant 3 : index
    %c0_116 = arith.constant 0 : index
    %c0_117 = arith.constant 0 : index
    %163 = vector.load %arg8[%c3_115, %c0_116, %c0_117] : memref<4x1x8xf32, #tpu.memory_space<vmem>>, vector<1x1x8xf32>
    %164 = vector.shape_cast %163 : vector<1x1x8xf32> to vector<1x8xf32>
    %165 = vector.broadcast %164 : vector<1x8xf32> to vector<8x8xf32>
    %166 = arith.addf %162, %165 : vector<8x8xf32>
    %c3_118 = arith.constant 3 : index
    %c0_119 = arith.constant 0 : index
    %c0_120 = arith.constant 0 : index
    %167 = vector.load %arg9[%c3_118, %c0_119, %c0_120] : memref<4x32x8xf32, #tpu.memory_space<vmem>>, vector<1x32x8xf32>
    %168 = vector.shape_cast %167 : vector<1x32x8xf32> to vector<32x8xf32>
    %cst_121 = arith.constant dense<0.000000e+00> : vector<8x8xf32>
    %169 = tpu.matmul %26, %168, %cst_121 {dimension_numbers = #tpu.dot_dimension_numbers<[1], [0], [0], [1], [0, 0, 1, 1], [], []>} : vector<8x32xf32>, vector<32x8xf32>, vector<8x8xf32> -> vector<8x8xf32>
    %c3_122 = arith.constant 3 : index
    %c0_123 = arith.constant 0 : index
    %c0_124 = arith.constant 0 : index
    %170 = vector.load %arg10[%c3_122, %c0_123, %c0_124] : memref<4x1x8xf32, #tpu.memory_space<vmem>>, vector<1x1x8xf32>
    %171 = vector.shape_cast %170 : vector<1x1x8xf32> to vector<1x8xf32>
    %172 = vector.broadcast %171 : vector<1x8xf32> to vector<8x8xf32>
    %173 = arith.addf %169, %172 : vector<8x8xf32>
    %cst_125 = arith.constant dense<0.000000e+00> : vector<8x8xf32>
    %174 = tpu.matmul %159, %166, %cst_125 {dimension_numbers = #tpu.dot_dimension_numbers<[1], [1], [0], [0], [0, 0, 1, 0], [], []>} : vector<8x8xf32>, vector<8x8xf32>, vector<8x8xf32> -> vector<8x8xf32>
    %cst_126 = arith.constant 0.000000e+00 : f32
    %175 = vector.broadcast %cst_126 : f32 to vector<8x8xf32>
    %176 = arith.cmpf ogt, %28, %175 : vector<8x8xf32>
    %cst_127 = arith.constant -1.000000e+09 : f32
    %177 = vector.broadcast %cst_127 : f32 to vector<8x8xf32>
    %178 = arith.select %176, %174, %177 : vector<8x8xi1>, vector<8x8xf32>
    %cst_128 = arith.constant dense<0xFF800000> : vector<8xf32>
    %179 = vector.multi_reduction <maximumf>, %178, %cst_128 [1] : vector<8x8xf32> to vector<8xf32>
    %180 = vector.shape_cast %179 : vector<8xf32> to vector<8x1xf32>
    %181 = vector.broadcast %180 : vector<8x1xf32> to vector<8x8xf32>
    %182 = arith.subf %178, %181 : vector<8x8xf32>
    %183 = math.exp %182 : vector<8x8xf32>
    %cst_129 = arith.constant dense<0.000000e+00> : vector<8xf32>
    %184 = vector.multi_reduction <add>, %183, %cst_129 [1] : vector<8x8xf32> to vector<8xf32>
    %185 = vector.shape_cast %184 : vector<8xf32> to vector<8x1xf32>
    %cst_130 = arith.constant dense<0.000000e+00> : vector<8x8xf32>
    %186 = tpu.matmul %183, %173, %cst_130 {dimension_numbers = #tpu.dot_dimension_numbers<[1], [0], [0], [1], [0, 0, 1, 1], [], []>} : vector<8x8xf32>, vector<8x8xf32>, vector<8x8xf32> -> vector<8x8xf32>
    %187 = tpu.reciprocal %185 {approx = true} : vector<8x1xf32> -> vector<8x1xf32>
    %188 = vector.broadcast %187 : vector<8x1xf32> to vector<8x8xf32>
    %189 = arith.mulf %186, %188 : vector<8x8xf32>
    %c3_131 = arith.constant 3 : index
    %c0_132 = arith.constant 0 : index
    %c0_133 = arith.constant 0 : index
    %190 = vector.load %arg11[%c3_131, %c0_132, %c0_133] : memref<4x8x32xf32, #tpu.memory_space<vmem>>, vector<1x8x32xf32>
    %191 = vector.shape_cast %190 : vector<1x8x32xf32> to vector<8x32xf32>
    %cst_134 = arith.constant dense<0.000000e+00> : vector<8x32xf32>
    %192 = tpu.matmul %189, %191, %cst_134 {dimension_numbers = #tpu.dot_dimension_numbers<[1], [0], [0], [1], [0, 0, 1, 1], [], []>} : vector<8x8xf32>, vector<8x32xf32>, vector<8x32xf32> -> vector<8x32xf32>
    %193 = arith.addf %152, %192 : vector<8x32xf32>
    %194 = arith.addf %1, %193 : vector<8x32xf32>
    %c0_135 = arith.constant 0 : index
    %c0_136 = arith.constant 0 : index
    %195 = vector.load %arg12[%c0_135, %c0_136] : memref<1x32xf32, #tpu.memory_space<vmem>>, vector<1x32xf32>
    %196 = vector.broadcast %195 : vector<1x32xf32> to vector<8x32xf32>
    %197 = arith.addf %194, %196 : vector<8x32xf32>
    %c0_137 = arith.constant 0 : index
    %c0_138 = arith.constant 0 : index
    %c0_139 = arith.constant 0 : index
    %198 = vector.load %arg13[%c0_137, %c0_138, %c0_139] : memref<1x8x32xf32, #tpu.memory_space<vmem>>, vector<1x8x32xf32>
    %199 = vector.shape_cast %198 : vector<1x8x32xf32> to vector<8x32xf32>
    %200 = vector.shape_cast %197 : vector<8x32xf32> to vector<1x8x32xf32>
    tpu.vector_store %arg13[%c0_137, %c0_138, %c0_139], %200 {strides = array<i32>} : memref<1x8x32xf32, #tpu.memory_space<vmem>>, vector<1x8x32xf32>,
    return
  }
  func.func @transform_0(%arg0: i32) -> (i32, i32, i32) {
    %c0_i32 = arith.constant 0 : i32
    %c0_i32_0 = arith.constant 0 : i32
    %c0_i32_1 = arith.constant 0 : i32
    return %arg0, %c0_i32, %c0_i32_0 : i32, i32, i32
  }
  func.func @transform_1(%arg0: i32) -> (i32, i32, i32) {
    %c0_i32 = arith.constant 0 : i32
    %c0_i32_0 = arith.constant 0 : i32
    %c0_i32_1 = arith.constant 0 : i32
    return %arg0, %c0_i32, %c0_i32_0 : i32, i32, i32
  }
  func.func @transform_2(%arg0: i32) -> (i32, i32) {
    %c0_i32 = arith.constant 0 : i32
    %c0_i32_0 = arith.constant 0 : i32
    %c0_i32_1 = arith.constant 0 : i32
    return %c0_i32, %c0_i32_0 : i32, i32
  }
  func.func @transform_3(%arg0: i32) -> (i32, i32) {
    %c0_i32 = arith.constant 0 : i32
    %c0_i32_0 = arith.constant 0 : i32
    %c0_i32_1 = arith.constant 0 : i32
    return %c0_i32, %c0_i32_0 : i32, i32
  }
  func.func @transform_4(%arg0: i32) -> (i32, i32, i32) {
    %c0_i32 = arith.constant 0 : i32
    %c0_i32_0 = arith.constant 0 : i32
    %c0_i32_1 = arith.constant 0 : i32
    %c0_i32_2 = arith.constant 0 : i32
    return %c0_i32, %c0_i32_0, %c0_i32_1 : i32, i32, i32
  }
  func.func @transform_5(%arg0: i32) -> (i32, i32, i32) {
    %c0_i32 = arith.constant 0 : i32
    %c0_i32_0 = arith.constant 0 : i32
    %c0_i32_1 = arith.constant 0 : i32
    %c0_i32_2 = arith.constant 0 : i32
    return %c0_i32, %c0_i32_0, %c0_i32_1 : i32, i32, i32
  }
  func.func @transform_6(%arg0: i32) -> (i32, i32, i32) {
    %c0_i32 = arith.constant 0 : i32
    %c0_i32_0 = arith.constant 0 : i32
    %c0_i32_1 = arith.constant 0 : i32
    %c0_i32_2 = arith.constant 0 : i32
    return %c0_i32, %c0_i32_0, %c0_i32_1 : i32, i32, i32
  }
  func.func @transform_7(%arg0: i32) -> (i32, i32, i32) {
    %c0_i32 = arith.constant 0 : i32
    %c0_i32_0 = arith.constant 0 : i32
    %c0_i32_1 = arith.constant 0 : i32
    %c0_i32_2 = arith.constant 0 : i32
    return %c0_i32, %c0_i32_0, %c0_i32_1 : i32, i32, i32
  }
  func.func @transform_8(%arg0: i32) -> (i32, i32, i32) {
    %c0_i32 = arith.constant 0 : i32
    %c0_i32_0 = arith.constant 0 : i32
    %c0_i32_1 = arith.constant 0 : i32
    %c0_i32_2 = arith.constant 0 : i32
    return %c0_i32, %c0_i32_0, %c0_i32_1 : i32, i32, i32
  }
  func.func @transform_9(%arg0: i32) -> (i32, i32, i32) {
    %c0_i32 = arith.constant 0 : i32
    %c0_i32_0 = arith.constant 0 : i32
    %c0_i32_1 = arith.constant 0 : i32
    %c0_i32_2 = arith.constant 0 : i32
    return %c0_i32, %c0_i32_0, %c0_i32_1 : i32, i32, i32
  }
  func.func @transform_10(%arg0: i32) -> (i32, i32, i32) {
    %c0_i32 = arith.constant 0 : i32
    %c0_i32_0 = arith.constant 0 : i32
    %c0_i32_1 = arith.constant 0 : i32
    %c0_i32_2 = arith.constant 0 : i32
    return %c0_i32, %c0_i32_0, %c0_i32_1 : i32, i32, i32
  }
  func.func @transform_11(%arg0: i32) -> (i32, i32) {
    %c0_i32 = arith.constant 0 : i32
    %c0_i32_0 = arith.constant 0 : i32
    %c0_i32_1 = arith.constant 0 : i32
    return %c0_i32, %c0_i32_0 : i32, i32
  }
  func.func @transform_12(%arg0: i32) -> (i32, i32, i32) {
    %c0_i32 = arith.constant 0 : i32
    %c0_i32_0 = arith.constant 0 : i32
    %c0_i32_1 = arith.constant 0 : i32
    return %arg0, %c0_i32, %c0_i32_0 : i32, i32, i32
  }
}

</mosaic_0001>

<bundles_post_ra>
// kernel: tpu_custom_call.1
= control target key start
LH: loop header
LB: loop body
LE: loop exit
PB: predicated region body
PF: predicated region fallthrough
CT: control target
= control target key end

     0   :  { %s3551_s0 = inlined_call_operand.vmem [shape: f32[2,8,32], index: 0, kind: input, shape index: {}]   ;;  %s3552_s1 = inlined_call_operand.vmem [shape: f32[2,8,8], index: 1, kind: input, shape index: {}]   ;;  %s3553_s2 = inlined_call_operand.vmem [shape: f32[1,32], index: 2, kind: input, shape index: {}]   ;;  %s3554_s3 = inlined_call_operand.vmem [shape: f32[1,32], index: 3, kind: input, shape index: {}]   ;;  %s3555_s4 = inlined_call_operand.vmem [shape: f32[4,32,8], index: 4, kind: input, shape index: {}]   ;;  %s3556_s5 = inlined_call_operand.vmem [shape: f32[4,1,8], index: 5, kind: input, shape index: {}]   ;;  %s3557_s6 = inlined_call_operand.vmem [shape: f32[4,32,8], index: 6, kind: input, shape index: {}]   ;;  %s3558_s7 = inlined_call_operand.vmem [shape: f32[4,1,8], index: 7, kind: input, shape index: {}]   ;;  %s3559_s8 = inlined_call_operand.vmem [shape: f32[4,32,8], index: 8, kind: input, shape index: {}]   ;;  %s3560_s9 = inlined_call_operand.vmem [shape: f32[4,1,8], index: 9, kind: input, shape index: {}]   ;;  %s3561_s10 = inlined_call_operand.vmem [shape: f32[4,8,32], index: 10, kind: input, shape index: {}]   ;;  %s3562_s11 = inlined_call_operand.vmem [shape: f32[1,32], index: 11, kind: input, shape index: {}]   ;;  %s3563_s12 = inlined_call_operand.hbm [shape: f32[2,8,32], index: 12, kind: output, shape index: {}]  }
   0x1   :  { %3564 = sst [smem:[#allocation5_spill]] %s3551_s0 }
   0x2   :  { %3565 = sst [smem:[#allocation6_spill]] %s3552_s1 }
   0x3   :  { %3566 = sst [smem:[#allocation7_spill]] %s3553_s2 }
   0x4   :  { %17 = vsyncpa [#allocation3], 0 }
   0x5   :  { %19 = vsyncpa [#allocation3 + $0x1], 0  ;;  %s3070_s21 = smov 0   ;;  %s3072_s22 = smov 0  }
   0x6   :  { %s3074_s23 = smov 0   ;;  %s3076_s24 = smov 0  }
   0x7 LB: > { %s3091_s25 = sadd.s32 4294967295, %s3000_s24   ;;  %s2501_s26 = sadd.s32 4294967294, %s3000_s24   ;;  %s3000_s24 = sphi %s3076_s24, %s3575_s24   ;;  %s2996_s23 = sphi %s3074_s23, %s3574_s23   ;;  %s2992_s22 = sphi %s3072_s22, %s3573_s22   ;;  %s2988_s21 = sphi %s3070_s21, %s3572_s21  }
   0x8   : > { %s3095_s27 = sadd.s32 1, %s3000_s24   ;;  %s294_s28 = sadd.s32 1, %s2996_s23 }
   0x9   : > { %s291_s29 = ssub.s32 %s3000_s24, %s3095_s27  ;;  %p304_p0 = scmp.ne.s32.totalorder %s2996_s23, %s2992_s22 }
   0xa   : > { %p292_p1 = scmp.eq.s32.totalorder %s291_s29, 0  ;;  %p305_p2 = scmp.eq.s32.totalorder %s3091_s25, 1 }
   0xb   : > { %p310_p3 = scmp.ne.s32.totalorder %s2992_s22, %s2988_s21  ;;  %p311_p4 = scmp.eq.s32.totalorder %s2501_s26, 1 }
   0xc   : > { %s3106_s30 = scalar_select %p292_p1, %s2996_s23, %s294_s28  }
   0xd   : > { %p3108_p5 = por %p305_p2, %p304_p0  ;;  %p3112_p6 = por %p311_p4, %p310_p3 }
   0xe   : > { %p2504_p7 = scmp.ge.s32.totalorder %s3000_s24, 1  ;;  %p373_p8 = scmp.lt.s32.totalorder %s3000_s24, 3 }
  0x10   : > { %p374_p9 = pnand %p2504_p7, %p373_p8 }
  0x11   : > { %p418_p10 = scmp.lt.s32.totalorder (!%p374_p9), %s3091_s25, 1  ;;  %s3569_s0 = sld [smem:[#allocation5_spill]] (!%p374_p9) }
  0x12   : > { %377 = sbr.rel (%p374_p9) target bundleno = 3366 (0xd26), region = 68  ;;  %s3570_s2 = sld [smem:[#allocation7_spill]] (!%p374_p9) }
  0x13   : > { %s3571_s1 = sld [smem:[#allocation6_spill]] (!%p374_p9)  ;;  %s415_s17 = sand.u32 (!%p374_p9), 1, %s2992_s22  }
  0x14   : > { %s2600_s20 = sshll.u32 (!%p374_p9), %s3091_s25, 7  ;;  %s3004_s18 = smov (!%p374_p9), [#allocation2]  }
  0x17   : > { %s3120_s15 = scalar_select %p418_p10, %s3091_s25, 1  ;;  %vm429_vm0 = vcmask 261120   ;;  %v3002_v7 = vmov 0.0   ;;  %v469_v8 = vld [vmem:[%s3555_s4 + $0x18] sm:$0xff]  ;;  %v468_v10 = vld [vmem:[%s3555_s4 + $0x10] sm:$0xff]  ;;  %v467_v12 = vld [vmem:[%s3555_s4 + $0x8] sm:$0xff] }
  0x18   : > { %2687 = vmatprep.subr.mxu0 %v3002_v7  ;;  %2698 = vmatprep.subr.mxu1 %v3002_v7  ;;  %v553_v9 = vld [vmem:[%s3557_s6 + $0x18] sm:$0xff]  ;;  %v552_v11 = vld [vmem:[%s3557_s6 + $0x10] sm:$0xff]  ;;  %v551_v13 = vld [vmem:[%s3557_s6 + $0x8] sm:$0xff]  ;;  %vm3003_vm1 = vmmov 0   ;;  %vm712_vm4 = vcmask 64512   ;;  %s2944_s25 = sshll.u32 %s3004_s18, 4  ;;  %s2945_s25 = int_to_ptr.vmem [resolvable:$false] %s2944_s25 }
  0x19   : > { %s2506_s16 = sshll.u32 %s3120_s15, 3  ;;  %2688 = vmatpush3.msra.mxu0 %v469_v8  ;;  %2699 = vmatpush3.msra.mxu1 %v553_v9  ;;  %v466_v14 = vld [vmem:[%s3555_s4] sm:$0xff]  ;;  %v634_v30 = vld [vmem:[%s3559_s8 + $0x18] sm:$0xff]  ;;  %v633_v31 = vld [vmem:[%s3559_s8 + $0x10] sm:$0xff] }
  0x1a   : > { %s421_s19 = scalar_lea.vmem %s3569_s0, %s2506_s16  ;;  %2689 = vmatprep.subr.mxu0 %v3002_v7  ;;  %2700 = vmatprep.subr.mxu1 %v3002_v7  ;;  %v550_v15 = vld [vmem:[%s3557_s6] sm:$0xff]  ;;  %v632_v32 = vld [vmem:[%s3559_s8 + $0x8] sm:$0xff]  ;;  %v2522_v34 = vld [vmem:[%s3555_s4 + $0x38] sm:$0xff]  ;;  %s425_s29 = scalar_lea.vmem %s3571_s1, %s2506_s16 }
  0x1b   : > { %v3128_v0 = vld [vmem:[%s421_s19] sm:$0xff]  ;;  %2690 = vmatpush3.msra.mxu0 %v468_v10  ;;  %2701 = vmatpush3.msra.mxu1 %v552_v11  ;;  %v2521_v35 = vld [vmem:[%s3555_s4 + $0x30] sm:$0xff]  ;;  %v2520_v36 = vld [vmem:[%s3555_s4 + $0x28] sm:$0xff]  ;;  %s2505_s16 = sshll.u32 %s415_s17, 3  ;;  %s2428_s0 = scalar_lea.hbm %s3563_s12, %s2600_s20 }
  0x1c   : > { %v430_v1 = vsel %vm429_vm0, %v3128_v0, 0.0  ;;  %2691 = vmatprep.subr.mxu0 %v3002_v7  ;;  %2702 = vmatprep.subr.mxu1 %v3002_v7  ;;  %v2508_v24 = vld [vmem:[%s3570_s2] ss:$0 sm:$0xff]  ;;  %v2536_v38 = vld [vmem:[%s3559_s8 + $0x38] sm:$0xff]  ;;  %v2535_v39 = vld [vmem:[%s3559_s8 + $0x30] sm:$0xff]  ;;  %s417_s26 = scalar_lea.vmem [#allocation2], %s2505_s16 }
  0x1d   : > { %431 = vadd.xlane.f32.xlu0 %v430_v1  ;;  %2692 = vmatpush3.msra.mxu0 %v467_v12  ;;  %v2509_v27 = vld [vmem:[%s3554_s3] ss:$0 sm:$0xff]  ;;  %v2534_v40 = vld [vmem:[%s3559_s8 + $0x28] sm:$0xff]  ;;  %v2531_v12 = vld [vmem:[%s3558_s7 + $0x1] ss:$0 sm:$0xff]  ;;  %s2430_s28 = sshll.u32 %s417_s26, 4  ;;  %s2431_s28 = int_to_ptr.vmem [resolvable:$true] %s2430_s28 }
  0x1e   : > { %2693 = vmatprep.subr.mxu0 %v3002_v7  ;;  %2703 = vmatpush3.msra.mxu1 %v551_v13  ;;  %v631_v33 = vld [vmem:[%s3559_s8] sm:$0xff]  ;;  %v2527_v8 = vld [vmem:[%s3557_s6 + $0x28] sm:$0xff]  ;;  %s2417_s1 = scalar_lea.sflag [#allocation3], %s415_s17  ;;  %s2940_s2 = scalar_lea.vmem %s2431_s28, 128 }
  0x1f   : > { %2694 = vmatpush3.msra.mxu0 %v466_v14  ;;  %2704 = vmatprep.subr.mxu1 %v3002_v7  ;;  %v2519_v37 = vld [vmem:[%s3555_s4 + $0x20] sm:$0xff]  ;;  %p2941_p11 = scmp.ne.s32.totalorder %s2431_s28, %s2940_s2  ;;  %s2946_s16 = scalar_lea.vmem %s2945_s25, 256 }
  0x20   : > { %2695 = vmatprep.mubr.msk.f32.mxu0 %vm3003_vm1, %v3002_v7  ;;  %2705 = vmatpush3.msra.mxu1 %v550_v15  ;;  %v2533_v41 = vld [vmem:[%s3559_s8 + $0x20] sm:$0xff]  ;;  %p2947_p0 = scmp.lt.s32.totalorder %s2431_s28, %s2945_s25  ;;  %p2948_p1 = scmp.lt.s32.totalorder %s2946_s16, %s2940_s2 }
  0x21   : > { %2706 = vmatprep.mubr.msk.f32.mxu1 %vm3003_vm1, %v3002_v7  ;;  %2709 = vmatprep.subr.mxu0 %v3002_v7  ;;  %v2512_v42 = vld [vmem:[%s3558_s7] ss:$0 sm:$0xff]  ;;  %v2524_v14 = vld [vmem:[%s3556_s5 + $0x1] ss:$0 sm:$0xff]  ;;  %p2942_p12 = pnand %p2941_p11, %p3108_p5 }
  0x22   : > { %2720 = vmatprep.subr.mxu1 %v3002_v7  ;;  %v2510_v45 = vld [vmem:[%s3556_s5] ss:$0 sm:$0xff]  ;;  %p2949_p2 = por %p2948_p1, %p2947_p0 }
  0x23   : > { %v2514_v50 = vld [vmem:[%s3560_s9] ss:$0 sm:$0xff]  ;;  %p2943_p13 = pneg %p2942_p12 }
  0x24   : > { %v3268_v58 = vld [vmem:[%s425_s29] sm:$0xff] }
  0x25   : > { %vm789_vm5 = vcmp.gt.f32.partialorder %v3268_v58, 0.0  ;;  %v2526_v9 = vld [vmem:[%s3557_s6 + $0x20] sm:$0xff]  ;;  %p2950_p3 = pnand %p2949_p2, %p2943_p13 }
  0xa6   : > { %v432_v2 = vpop.xlane.xlu0 %431 }
  0xa7   : > { %v434_v3 = vmul.f32 0.03125, %v432_v2 }
  0xa9   : > { %v435_v4 = vsub.f32 %v3128_v0, %v434_v3  ;;  %v2529_v3 = vld [vmem:[%s3557_s6 + $0x38] sm:$0xff] }
  0xab   : > { %v436_v5 = vmul.f32 %v435_v4, %v435_v4  ;;  %v456_v25 = vmul.f32 %v2508_v24, %v435_v4 }
  0xad   : > { %v437_v6 = vsel %vm429_vm0, %v436_v5, 0.0 }
  0xae   : > { %438 = vadd.xlane.f32.xlu0 %v437_v6  ;;  %v2528_v6 = vld [vmem:[%s3557_s6 + $0x30] sm:$0xff] }
 0x137   : > { %v439_v16 = vpop.xlane.xlu0 %438 }
 0x138   : > { %v440_v17 = vmul.f32 0.032258064, %v439_v16  ;;  %v2538_v16 = vld [vmem:[%s3560_s9 + $0x1] ss:$0 sm:$0xff] }
 0x13a   : > { %2920 = vrsqrt.f32 %v440_v17  ;;  %vm443_vm2 = vcmp.eq.f32.partialorder %v440_v17, inf  ;;  %v446_v20 = vand.u32 2147483648, %v440_v17  ;;  %vm445_vm3 = vcmp.eq.f32.partialorder %v440_v17, 0.0 }
 0x147   : > { %v2921_v18 = vpop.eup %2920 }
 0x148   : > { %v442_v19 = vmul.f32 %v2921_v18, %v440_v17 }
 0x14a   : > { %v444_v21 = vsel %vm443_vm2, %v440_v17, %v442_v19 }
 0x14b   : > { %v447_v22 = vsel %vm445_vm3, %v446_v20, %v444_v21 }
 0x14c   : > { %v448_v23 = vadd.f32 1e-06, %v447_v22 }
 0x14e   : > { %2922 = vrcp.f32 %v448_v23 }
 0x15b   : > { %v2923_v26 = vpop.eup %2922 }
 0x15c   : > { %v457_v28 = vmul.f32 %v2923_v26, %v456_v25 }
 0x15e   : > { %v3178_v29 = vadd.f32 %v2509_v27, %v457_v28  ;;  %v875_v28 = vld [vmem:[%s3561_s10] sm:$0xff] }
 0x160   : > { %2696 = vmatmul.mubr.msk.f32.vlgmr.msra.gmra.mxu0 %vm429_vm0, %v3178_v29  ;;  %2707 = vmatmul.mubr.msk.f32.vlgmr.msra.gmra.mxu1 %vm429_vm0, %v3178_v29 }
 0x161   : > { %2710 = vmatpush3.msra.mxu0 %v634_v30  ;;  %2717 = vmatprep.mubr.msk.f32.mxu0 %vm3003_vm1, %v3002_v7 }
 0x162   : > { %2711 = vmatprep.subr.mxu0 %v3002_v7  ;;  %2722 = vmatprep.mubr.msk.f32.mxu1 %vm3003_vm1, %v3002_v7 }
 0x163   : > { %2712 = vmatpush3.msra.mxu0 %v633_v31 }
 0x164   : > { %2713 = vmatprep.subr.mxu0 %v3002_v7 }
 0x165   : > { %2714 = vmatpush3.msra.mxu0 %v632_v32 }
 0x166   : > { %2715 = vmatprep.subr.mxu0 %v3002_v7 }
 0x167   : > { %2716 = vmatpush3.msra.mxu0 %v631_v33 }
 0x168   : > { %2718 = vmatmul.mubr.msk.f32.vlgmr.msra.gmra.mxu0 %vm429_vm0, %v3178_v29  ;;  %2730 = vmatprep.subr.mxu0 %v3002_v7 }
 0x169   : > { %2731 = vmatpush3.msra.mxu0 %v2522_v34  ;;  %2738 = vmatprep.mubr.msk.f32.mxu0 %vm3003_vm1, %v3002_v7  ;;  %v2556_v34 = vld [vmem:[%s3557_s6 + $0x58] sm:$0xff] }
 0x16a   : > { %2732 = vmatprep.subr.mxu0 %v3002_v7 }
 0x16b   : > { %2733 = vmatpush3.msra.mxu0 %v2521_v35  ;;  %v2555_v35 = vld [vmem:[%s3557_s6 + $0x50] sm:$0xff] }
 0x16c   : > { %2734 = vmatprep.subr.mxu0 %v3002_v7 }
 0x16d   : > { %2735 = vmatpush3.msra.mxu0 %v2520_v36  ;;  %v2554_v36 = vld [vmem:[%s3557_s6 + $0x48] sm:$0xff] }
 0x16e   : > { %2736 = vmatprep.subr.mxu0 %v3002_v7 }
 0x16f   : > { %2737 = vmatpush3.msra.mxu0 %v2519_v37  ;;  %v2553_v37 = vld [vmem:[%s3557_s6 + $0x40] sm:$0xff] }
 0x170   : > { %2739 = vmatmul.mubr.msk.f32.vlgmr.msra.gmra.mxu0 %vm429_vm0, %v3178_v29  ;;  %2752 = vmatprep.subr.mxu0 %v3002_v7 }
 0x171   : > { %2753 = vmatpush3.msra.mxu0 %v2536_v38  ;;  %2760 = vmatprep.mubr.msk.f32.mxu0 %vm3003_vm1, %v3002_v7  ;;  %v2543_v38 = vld [vmem:[%s3561_s10 + $0x8] sm:$0xff] }
 0x172   : > { %2754 = vmatprep.subr.mxu0 %v3002_v7 }
 0x173   : > { %2755 = vmatpush3.msra.mxu0 %v2535_v39 }
 0x174   : > { %2756 = vmatprep.subr.mxu0 %v3002_v7 }
 0x175   : > { %2757 = vmatpush3.msra.mxu0 %v2534_v40 }
 0x176   : > { %2758 = vmatprep.subr.mxu0 %v3002_v7 }
 0x177   : > { %2759 = vmatpush3.msra.mxu0 %v2533_v41 }
 0x178   : > { %2761 = vmatmul.mubr.msk.f32.vlgmr.msra.gmra.mxu0 %vm429_vm0, %v3178_v29  ;;  %2773 = vmatprep.subr.mxu0 %v3002_v7 }
 0x179   : > { %2775 = vmatprep.mubr.msk.f32.mxu0 %vm3003_vm1, %v3002_v7  ;;  %2774 = vmatpush3.msra.mxu0 %v2543_v38 }
 0x17a   : > { %2783 = vmatprep.subr.mxu0 %v3002_v7 }
 0x220   : > { %v546_v43 = vpop.f32.mrf.mxu0  ;;  %v627_v44 = vpop.f32.mrf.mxu1 }
 0x221   : > { %v628_v46 = vadd.f32 %v2512_v42, %v627_v44  ;;  %v547_v49 = vadd.f32 %v2510_v45, %v546_v43  ;;  %v2549_v43 = vld [vmem:[%s3555_s4 + $0x58] sm:$0xff]  ;;  %v2548_v45 = vld [vmem:[%s3555_s4 + $0x50] sm:$0xff] }
 0x222   : > { %v2697_v47 = vpop.f32.mrf.mxu0  ;;  %v2708_v48 = vpop.f32.mrf.mxu1 }
 0x223   : > { %2721 = vmatpush3.xpose.msk.msra.mxu1 %vm712_vm4, %v628_v46  ;;  %v2547_v47 = vld [vmem:[%s3555_s4 + $0x48] sm:$0xff] }
 0x224   : > { %2725 = vmatprep.subr.mxu1 %v3002_v7 }
 0x226   : > { %2723 = vmatmul.mubr.msk.f32.vlgmr.msra.gmra.mxu1 %vm712_vm4, %v547_v49  ;;  %v2546_v49 = vld [vmem:[%s3555_s4 + $0x40] sm:$0xff] }
 0x227   : > { %2727 = vmatprep.mubr.msk.f32.mxu1 %vm3003_vm1, %v3002_v7 }
 0x228   : > { %v708_v51 = vpop.f32.mrf.mxu0 }
 0x229   : > { %v709_v52 = vadd.f32 %v2514_v50, %v708_v51  ;;  %v2563_v50 = vld [vmem:[%s3559_s8 + $0x58] sm:$0xff]  ;;  %v2558_v51 = vld [vmem:[%s3558_s7 + $0x2] ss:$0 sm:$0xff] }
 0x22a   : > { %v2719_v53 = vpop.f32.mrf.mxu0 }
 0x22b   : > { %2726 = vmatpush3.msra.mxu1 %v709_v52  ;;  %v2562_v52 = vld [vmem:[%s3559_s8 + $0x50] sm:$0xff] }
 0x22c   : > { %2741 = vmatprep.subr.mxu1 %v3002_v7 }
 0x230   : > { %v955_v54 = vpop.f32.mrf.mxu0 }
 0x231   : > { %v956_v18 = vadd.f32 %v2524_v14, %v955_v54  ;;  %v2575_v14 = vld [vmem:[%s3555_s4 + $0x78] sm:$0xff] }
 0x232   : > { %v2740_v55 = vpop.f32.mrf.mxu0 }
 0x233   : > { %v2561_v55 = vld [vmem:[%s3559_s8 + $0x48] sm:$0xff] }
 0x238   : > { %v1121_v56 = vpop.f32.mrf.mxu0 }
 0x239   : > { %v1122_v19 = vadd.f32 %v2538_v16, %v1121_v56 }
 0x23a   : > { %v2762_v57 = vpop.f32.mrf.mxu0 }
 0x23b   : > { %v2560_v57 = vld [vmem:[%s3559_s8 + $0x40] sm:$0xff] }
 0x2e6   : > { %v785_v59 = vpop.f32.mrf.mxu1 }
 0x2e7   : > { %v790_v60 = vsel %vm789_vm5, %v785_v59, -1e+09 }
 0x2e8   : > { %v2724_v61 = vpop.f32.mrf.mxu1  ;;  %v791_v62 = vsel %vm712_vm4, %v790_v60, -inf }
 0x2e9   : > { %792 = vmax.xlane.f32.xlu1 %v791_v62  ;;  %v2551_v61 = vld [vmem:[%s3556_s5 + $0x2] ss:$0 sm:$0xff] }
 0x372   : > { %v793_v63 = vpop.xlane.xlu1 %792 }
 0x373   : > { %v794_v1 = vsub.f32 %v790_v60, %v793_v63 }
 0x375   : > { %v795_v2 = vmul.f32 1.442695, %v794_v1 }
 0x377   : > { %2924 = vpow2.f32 %v795_v2  ;;  %v2565_v2 = vld [vmem:[%s3560_s9 + $0x2] ss:$0 sm:$0xff] }
 0x384   : > { %v2925_v4 = vpop.eup %2924 }
 0x385   : > { %2728 = vmatmul.mubr.msk.f32.vlgmr.msra.gmra.mxu1 %vm712_vm4, %v2925_v4  ;;  %v797_v5 = vsel %vm712_vm4, %v2925_v4, 0.0 }
 0x386   : > { %2742 = vmatpush3.msra.mxu1 %v2529_v3  ;;  %798 = vadd.xlane.f32.xlu0 %v797_v5 }
 0x387   : > { %2743 = vmatprep.subr.mxu1 %v3002_v7  ;;  %2749 = vmatprep.mubr.msk.f32.mxu1 %vm3003_vm1, %v3002_v7 }
 0x388   : > { %2744 = vmatpush3.msra.mxu1 %v2528_v6 }
 0x389   : > { %2745 = vmatprep.subr.mxu1 %v3002_v7 }
 0x38a   : > { %2746 = vmatpush3.msra.mxu1 %v2527_v8 }
 0x38b   : > { %2747 = vmatprep.subr.mxu1 %v3002_v7 }
 0x38c   : > { %2748 = vmatpush3.msra.mxu1 %v2526_v9 }
 0x38d   : > { %2750 = vmatmul.mubr.msk.f32.vlgmr.msra.gmra.mxu1 %vm429_vm0, %v3178_v29  ;;  %2763 = vmatprep.subr.mxu1 %v3002_v7 }
 0x38e   : > { %2765 = vmatprep.mubr.msk.f32.mxu1 %vm3003_vm1, %v3002_v7 }
 0x40f   : > { %v799_v27 = vpop.xlane.xlu0 %798 }
 0x445   : > { %v869_v10 = vpop.f32.mrf.mxu1 }
 0x447   : > { %v2729_v11 = vpop.f32.mrf.mxu1 }
 0x44d   : > { %v1038_v13 = vpop.f32.mrf.mxu1 }
 0x44e   : > { %v1039_v15 = vadd.f32 %v2531_v12, %v1038_v13 }
 0x44f   : > { %v2751_v17 = vpop.f32.mrf.mxu1 }
 0x450   : > { %2764 = vmatpush3.xpose.msk.msra.mxu1 %vm712_vm4, %v1039_v15  ;;  %v2574_v17 = vld [vmem:[%s3555_s4 + $0x70] sm:$0xff] }
 0x451   : > { %2768 = vmatprep.subr.mxu1 %v3002_v7 }
 0x453   : > { %2766 = vmatmul.mubr.msk.f32.vlgmr.msra.gmra.mxu1 %vm712_vm4, %v956_v18  ;;  %v2573_v18 = vld [vmem:[%s3555_s4 + $0x68] sm:$0xff] }
 0x454   : > { %2769 = vmatpush3.msra.mxu1 %v1122_v19  ;;  %2770 = vmatprep.mubr.msk.f32.mxu1 %vm3003_vm1, %v3002_v7  ;;  %v2572_v19 = vld [vmem:[%s3555_s4 + $0x60] sm:$0xff] }
 0x455   : > { %2778 = vmatprep.subr.mxu1 %v3002_v7 }
 0x513   : > { %v1197_v20 = vpop.f32.mrf.mxu1 }
 0x514   : > { %v1201_v21 = vsel %vm789_vm5, %v1197_v20, -1e+09  ;;  %v2589_v20 = vld [vmem:[%s3559_s8 + $0x78] sm:$0xff] }
 0x515   : > { %v2767_v22 = vpop.f32.mrf.mxu1  ;;  %v1202_v23 = vsel %vm712_vm4, %v1201_v21, -inf }
 0x516   : > { %1203 = vmax.xlane.f32.xlu1 %v1202_v23  ;;  %v2587_v22 = vld [vmem:[%s3559_s8 + $0x68] sm:$0xff]  ;;  %v2586_v23 = vld [vmem:[%s3559_s8 + $0x60] sm:$0xff] }
 0x59f   : > { %v1204_v24 = vpop.xlane.xlu1 %1203 }
 0x5a0   : > { %v1205_v25 = vsub.f32 %v1201_v21, %v1204_v24  ;;  %v2588_v21 = vld [vmem:[%s3559_s8 + $0x70] sm:$0xff] }
 0x5a1   : > { %v2570_v24 = vld [vmem:[%s3561_s10 + $0x10] sm:$0xff] }
 0x5a2   : > { %v1206_v26 = vmul.f32 1.442695, %v1205_v25 }
 0x5a4   : > { %2926 = vpow2.f32 %v1206_v26 }
 0x5a5   : > { %2928 = vrcp.f32 %v799_v27 }
 0x5b1   : > { %v2927_v30 = vpop.eup %2926 }
 0x5b2   : > { %2771 = vmatmul.mubr.msk.f32.vlgmr.msra.gmra.mxu1 %vm712_vm4, %v2927_v30  ;;  %v1208_v31 = vsel %vm712_vm4, %v2927_v30, 0.0  ;;  %v2929_v32 = vpop.eup %2928  ;;  %v2582_v30 = vld [vmem:[%s3557_s6 + $0x78] sm:$0xff] }
 0x5b3   : > { %1209 = vadd.xlane.f32.xlu1 %v1208_v31  ;;  %2779 = vmatpush3.msra.mxu1 %v875_v28  ;;  %v874_v33 = vmul.f32 %v2929_v32, %v869_v10  ;;  %v2581_v32 = vld [vmem:[%s3557_s6 + $0x70] sm:$0xff] }
 0x5b4   : > { %2780 = vmatprep.mubr.msk.f32.mxu1 %vm3003_vm1, %v3002_v7  ;;  %2794 = vmatprep.subr.mxu1 %v3002_v7 }
 0x5b6   : > { %2781 = vmatmul.mubr.msk.f32.vlgmr.msra.gmra.mxu1 %vm712_vm4, %v874_v33  ;;  %v2580_v33 = vld [vmem:[%s3557_s6 + $0x68] sm:$0xff] }
 0x5b7   : > { %2795 = vmatpush3.msra.mxu1 %v2556_v34  ;;  %2802 = vmatprep.mubr.msk.f32.mxu1 %vm3003_vm1, %v3002_v7  ;;  %v2579_v34 = vld [vmem:[%s3557_s6 + $0x60] sm:$0xff] }
 0x5b8   : > { %2796 = vmatprep.subr.mxu1 %v3002_v7 }
 0x5b9   : > { %2797 = vmatpush3.msra.mxu1 %v2555_v35 }
 0x5ba   : > { %2798 = vmatprep.subr.mxu1 %v3002_v7 }
 0x5bb   : > { %2799 = vmatpush3.msra.mxu1 %v2554_v36 }
 0x5bc   : > { %2800 = vmatprep.subr.mxu1 %v3002_v7 }
 0x5bd   : > { %2801 = vmatpush3.msra.mxu1 %v2553_v37 }
 0x5be   : > { %2803 = vmatmul.mubr.msk.f32.vlgmr.msra.gmra.mxu1 %vm429_vm0, %v3178_v29  ;;  %2816 = vmatprep.subr.mxu1 %v3002_v7 }
 0x5bf   : > { %2818 = vmatprep.mubr.msk.f32.mxu1 %vm3003_vm1, %v3002_v7 }
 0x63c   : > { %v1210_v39 = vpop.xlane.xlu1 %1209 }
 0x63d   : > { %2930 = vrcp.f32 %v1210_v39 }
 0x64a   : > { %v2931_v40 = vpop.eup %2930 }
 0x672   : > { %v1280_v41 = vpop.f32.mrf.mxu1 }
 0x673   : > { %v1285_v42 = vmul.f32 %v2931_v40, %v1280_v41 }
 0x674   : > { %v2772_v44 = vpop.f32.mrf.mxu1 }
 0x675   : > { %2776 = vmatmul.mubr.msk.f32.vlgmr.msra.gmra.mxu0 %vm712_vm4, %v1285_v42 }
 0x676   : > { %2784 = vmatpush3.msra.mxu0 %v2549_v43  ;;  %v3358_v46 = vpop.f32.mrf.mxu1  ;;  %2791 = vmatprep.mubr.msk.f32.mxu0 %vm3003_vm1, %v3002_v7  ;;  %v2584_v43 = vld [vmem:[%s3558_s7 + $0x3] ss:$0 sm:$0xff] }
 0x677   : > { %2785 = vmatprep.subr.mxu0 %v3002_v7 }
 0x678   : > { %2786 = vmatpush3.msra.mxu0 %v2548_v45  ;;  %v2782_v48 = vpop.f32.mrf.mxu1 }
 0x679   : > { %2787 = vmatprep.subr.mxu0 %v3002_v7 }
 0x67a   : > { %2788 = vmatpush3.msra.mxu0 %v2547_v47  ;;  %v2591_v47 = vld [vmem:[%s3560_s9 + $0x3] ss:$0 sm:$0xff] }
 0x67b   : > { %2789 = vmatprep.subr.mxu0 %v3002_v7 }
 0x67c   : > { %2790 = vmatpush3.msra.mxu0 %v2546_v49 }
 0x67d   : > { %2792 = vmatmul.mubr.msk.f32.vlgmr.msra.gmra.mxu0 %vm429_vm0, %v3178_v29  ;;  %2805 = vmatprep.subr.mxu0 %v3002_v7 }
 0x67e   : > { %v1596_v53 = vpop.f32.mrf.mxu1  ;;  %2806 = vmatpush3.msra.mxu0 %v2563_v50  ;;  %2813 = vmatprep.mubr.msk.f32.mxu0 %vm3003_vm1, %v3002_v7 }
 0x67f   : > { %v1597_v54 = vadd.f32 %v2558_v51, %v1596_v53  ;;  %2807 = vmatprep.subr.mxu0 %v3002_v7 }
 0x680   : > { %v2804_v56 = vpop.f32.mrf.mxu1  ;;  %2808 = vmatpush3.msra.mxu0 %v2562_v52 }
 0x681   : > { %2809 = vmatprep.subr.mxu0 %v3002_v7  ;;  %2817 = vmatpush3.xpose.msk.msra.mxu1 %vm712_vm4, %v1597_v54 }
 0x682   : > { %2810 = vmatpush3.msra.mxu0 %v2561_v55  ;;  %2821 = vmatprep.subr.mxu1 %v3002_v7 }
 0x683   : > { %2811 = vmatprep.subr.mxu0 %v3002_v7 }
 0x684   : > { %2812 = vmatpush3.msra.mxu0 %v2560_v57 }
 0x685   : > { %2814 = vmatmul.mubr.msk.f32.vlgmr.msra.gmra.mxu0 %vm429_vm0, %v3178_v29  ;;  %2826 = vmatprep.subr.mxu0 %v3002_v7 }
 0x686   : > { %2828 = vmatprep.mubr.msk.f32.mxu0 %vm3003_vm1, %v3002_v7  ;;  %2827 = vmatpush3.msra.mxu0 %v2570_v24 }
 0x687   : > { %2842 = vmatprep.subr.mxu0 %v3002_v7 }
 0x735   : > { %v3401_v59 = vpop.f32.mrf.mxu0 }
 0x736   : > { %v1431_v39 = vadd.f32 %v3358_v46, %v3401_v59 }
 0x737   : > { %v2777_v60 = vpop.f32.mrf.mxu0 }
 0x73d   : > { %v1513_v62 = vpop.f32.mrf.mxu0 }
 0x73e   : > { %v1514_v63 = vadd.f32 %v2551_v61, %v1513_v62 }
 0x73f   : > { %v2793_v1 = vpop.f32.mrf.mxu0 }
 0x740   : > { %2819 = vmatmul.mubr.msk.f32.vlgmr.msra.gmra.mxu1 %vm712_vm4, %v1514_v63 }
 0x741   : > { %2823 = vmatprep.mubr.msk.f32.mxu1 %vm3003_vm1, %v3002_v7 }
 0x745   : > { %v1679_v3 = vpop.f32.mrf.mxu0 }
 0x746   : > { %v1680_v4 = vadd.f32 %v2565_v2, %v1679_v3  ;;  %v2598_v3 = vld [vmem:[%s3562_s11] ss:$0 sm:$0xff] }
 0x747   : > { %v2815_v5 = vpop.f32.mrf.mxu0 }
 0x748   : > { %2822 = vmatpush3.msra.mxu1 %v1680_v4 }
 0x749   : > { %2831 = vmatprep.subr.mxu1 %v3002_v7 }
 0x800   : > { %v1755_v6 = vpop.f32.mrf.mxu1 }
 0x801   : > { %v1759_v8 = vsel %vm789_vm5, %v1755_v6, -1e+09 }
 0x802   : > { %v2820_v9 = vpop.f32.mrf.mxu1  ;;  %v1760_v10 = vsel %vm712_vm4, %v1759_v8, -inf }
 0x803   : > { %1761 = vmax.xlane.f32.xlu0 %v1760_v10 }
 0x88c   : > { %v1762_v11 = vpop.xlane.xlu0 %1761 }
 0x88d   : > { %v1763_v12 = vsub.f32 %v1759_v8, %v1762_v11 }
 0x88f   : > { %v1764_v13 = vmul.f32 1.442695, %v1763_v12 }
 0x891   : > { %2932 = vpow2.f32 %v1764_v13 }
 0x89e   : > { %v2933_v15 = vpop.eup %2932 }
 0x89f   : > { %2824 = vmatmul.mubr.msk.f32.vlgmr.msra.gmra.mxu1 %vm712_vm4, %v2933_v15  ;;  %v1766_v16 = vsel %vm712_vm4, %v2933_v15, 0.0 }
 0x8a0   : > { %2832 = vmatpush3.msra.mxu1 %v2575_v14  ;;  %1767 = vadd.xlane.f32.xlu1 %v1766_v16 }
 0x8a1   : > { %2833 = vmatprep.subr.mxu1 %v3002_v7  ;;  %2839 = vmatprep.mubr.msk.f32.mxu1 %vm3003_vm1, %v3002_v7 }
 0x8a2   : > { %2834 = vmatpush3.msra.mxu1 %v2574_v17 }
 0x8a3   : > { %2835 = vmatprep.subr.mxu1 %v3002_v7 }
 0x8a4   : > { %2836 = vmatpush3.msra.mxu1 %v2573_v18 }
 0x8a5   : > { %2837 = vmatprep.subr.mxu1 %v3002_v7 }
 0x8a6   : > { %2838 = vmatpush3.msra.mxu1 %v2572_v19 }
 0x8a7   : > { %2840 = vmatmul.mubr.msk.f32.vlgmr.msra.gmra.mxu1 %vm429_vm0, %v3178_v29  ;;  %2853 = vmatprep.subr.mxu1 %v3002_v7 }
 0x8a8   : > { %2854 = vmatpush3.msra.mxu1 %v2589_v20  ;;  %2861 = vmatprep.mubr.msk.f32.mxu1 %vm3003_vm1, %v3002_v7 }
 0x8a9   : > { %2855 = vmatprep.subr.mxu1 %v3002_v7 }
 0x8aa   : > { %2856 = vmatpush3.msra.mxu1 %v2588_v21 }
 0x8ab   : > { %2857 = vmatprep.subr.mxu1 %v3002_v7 }
 0x8ac   : > { %2858 = vmatpush3.msra.mxu1 %v2587_v22 }
 0x8ad   : > { %2859 = vmatprep.subr.mxu1 %v3002_v7 }
 0x8ae   : > { %2860 = vmatpush3.msra.mxu1 %v2586_v23 }
 0x8af   : > { %2862 = vmatmul.mubr.msk.f32.vlgmr.msra.gmra.mxu1 %vm429_vm0, %v3178_v29  ;;  %2874 = vmatprep.subr.mxu1 %v3002_v7 }
 0x8b0   : > { %2876 = vmatprep.mubr.msk.f32.mxu1 %vm3003_vm1, %v3002_v7 }
 0x929   : > { %v1768_v25 = vpop.xlane.xlu1 %1767 }
 0x92a   : > { %2934 = vrcp.f32 %v1768_v25 }
 0x937   : > { %v2935_v26 = vpop.eup %2934 }
 0x95f   : > { %v1838_v27 = vpop.f32.mrf.mxu1 }
 0x960   : > { %v1843_v28 = vmul.f32 %v2935_v26, %v1838_v27 }
 0x961   : > { %v2825_v31 = vpop.f32.mrf.mxu1 }
 0x962   : > { %2829 = vmatmul.mubr.msk.f32.vlgmr.msra.gmra.mxu0 %vm712_vm4, %v1843_v28 }
 0x963   : > { %2843 = vmatpush3.msra.mxu0 %v2582_v30  ;;  %2850 = vmatprep.mubr.msk.f32.mxu0 %vm3003_vm1, %v3002_v7 }
 0x964   : > { %2844 = vmatprep.subr.mxu0 %v3002_v7 }
 0x965   : > { %2845 = vmatpush3.msra.mxu0 %v2581_v32 }
 0x966   : > { %2846 = vmatprep.subr.mxu0 %v3002_v7 }
 0x967   : > { %v1999_v35 = vpop.f32.mrf.mxu1  ;;  %2847 = vmatpush3.msra.mxu0 %v2580_v33 }
 0x968   : > { %2848 = vmatprep.subr.mxu0 %v3002_v7 }
 0x969   : > { %v2841_v36 = vpop.f32.mrf.mxu1  ;;  %2849 = vmatpush3.msra.mxu0 %v2579_v34 }
 0x96a   : > { %2851 = vmatmul.mubr.msk.f32.vlgmr.msra.gmra.mxu0 %vm429_vm0, %v3178_v29  ;;  %2864 = vmatprep.subr.mxu0 %v3002_v7  ;;  %v2577_v29 = vld [vmem:[%s3556_s5 + $0x3] ss:$0 sm:$0xff] }
 0x96b   : > { %2866 = vmatprep.mubr.msk.f32.mxu0 %vm3003_vm1, %v3002_v7  ;;  %v2000_v46 = vadd.f32 %v2577_v29, %v1999_v35 }
 0x96f   : > { %v2165_v37 = vpop.f32.mrf.mxu1 }
 0x970   : > { %v2166_v49 = vadd.f32 %v2591_v47, %v2165_v37 }
 0x971   : > { %v2863_v38 = vpop.f32.mrf.mxu1 }
 0xa22   : > { %v1915_v40 = vpop.f32.mrf.mxu0 }
 0xa23   : > { %v1919_v41 = vadd.f32 %v1915_v40, %v1431_v39 }
 0xa24   : > { %v2830_v42 = vpop.f32.mrf.mxu0 }
 0xa2a   : > { %v2082_v44 = vpop.f32.mrf.mxu0 }
 0xa2b   : > { %v2083_v45 = vadd.f32 %v2584_v43, %v2082_v44 }
 0xa2c   : > { %v2852_v48 = vpop.f32.mrf.mxu0 }
 0xa2d   : > { %2865 = vmatpush3.xpose.msk.msra.mxu0 %vm712_vm4, %v2083_v45 }
 0xa2e   : > { %2869 = vmatprep.subr.mxu0 %v3002_v7 }
 0xa30   : > { %2867 = vmatmul.mubr.msk.f32.vlgmr.msra.gmra.mxu0 %vm712_vm4, %v2000_v46 }
 0xa31   : > { %2870 = vmatpush3.msra.mxu0 %v2166_v49  ;;  %2871 = vmatprep.mubr.msk.f32.mxu0 %vm3003_vm1, %v3002_v7  ;;  %v2596_v7 = vld [vmem:[%s3561_s10 + $0x18] sm:$0xff] }
 0xa32   : > { %2875 = vmatpush3.msra.mxu1 %v2596_v7 }
 0xaf0   : > { %v2241_v50 = vpop.f32.mrf.mxu0 }
 0xaf1   : > { %v2245_v51 = vsel %vm789_vm5, %v2241_v50, -1e+09 }
 0xaf2   : > { %v2868_v52 = vpop.f32.mrf.mxu0  ;;  %v2246_v53 = vsel %vm712_vm4, %v2245_v51, -inf }
 0xaf3   : > { %2247 = vmax.xlane.f32.xlu0 %v2246_v53 }
 0xb7c   : > { %v2248_v54 = vpop.xlane.xlu0 %2247 }
 0xb7d   : > { %v2249_v55 = vsub.f32 %v2245_v51, %v2248_v54 }
 0xb7f   : > { %v2250_v56 = vmul.f32 1.442695, %v2249_v55 }
 0xb81   : > { %2936 = vpow2.f32 %v2250_v56 }
 0xb8e   : > { %v2937_v57 = vpop.eup %2936 }
 0xb8f   : > { %2872 = vmatmul.mubr.msk.f32.vlgmr.msra.gmra.mxu0 %vm712_vm4, %v2937_v57  ;;  %v2252_v59 = vsel %vm712_vm4, %v2937_v57, 0.0 }
 0xb90   : > { %2253 = vadd.xlane.f32.xlu1 %v2252_v59 }
 0xc19   : > { %v2254_v58 = vpop.xlane.xlu1 %2253 }
 0xc1a   : > { %2938 = vrcp.f32 %v2254_v58 }
 0xc27   : > { %v2939_v60 = vpop.eup %2938 }
 0xc4f   : > { %v2324_v61 = vpop.f32.mrf.mxu0 }
 0xc50   : > { %v2329_v62 = vmul.f32 %v2939_v60, %v2324_v61 }
 0xc51   : > { %v2873_v63 = vpop.f32.mrf.mxu0 }
 0xc52   : > { %2877 = vmatmul.mubr.msk.f32.vlgmr.msra.gmra.mxu1 %vm712_vm4, %v2329_v62 }
 0xd12   : > { %v2401_v1 = vpop.f32.mrf.mxu1 }
 0xd13   : > { %v2405_v2 = vadd.f32 %v2401_v1, %v1919_v41 }
 0xd14   : > { %v2878_v4 = vpop.f32.mrf.mxu1 }
 0xd15   : > { %v2406_v5 = vadd.f32 %v2405_v2, %v3128_v0 }
 0xd17   : > { %v2414_v6 = vadd.f32 %v2598_v3, %v2406_v5 }
 0xd19   : > { %2415 = vst.msk [vmem:[%s417_s26] sm:$0xff] %vm429_vm0, %v2414_v6 }
 0xd1a   : > { %2953 = shalt.err (!%p2950_p3)
}
 0xd1b   : > { %s2954_s19 = scalar_lea.hbm %s2428_s0, 128  ;;  %s2958_s26 = scalar_lea.hbm %s3563_s12, 256 }
 0xd1c   : > { %p2955_p4 = scmp.ne.s32.totalorder %s2428_s0, %s2954_s19  ;;  %p2959_p9 = scmp.lt.s32.totalorder %s2428_s0, %s3563_s12 }
 0xd1d   : > { %p2960_p10 = scmp.lt.s32.totalorder %s2958_s26, %s2954_s19 }
 0xd1e   : > { %p2956_p7 = pnand %p2955_p4, %p3108_p5 }
 0xd1f   : > { %p2961_p11 = por %p2960_p10, %p2959_p9 }
 0xd20   : > { %p2957_p8 = pneg %p2956_p7 }
 0xd22   : > { %p2962_p12 = pnand %p2961_p11, %p2957_p8 }
 0xd24   : > { %2965 = shalt.err (!%p2962_p12)
}
 0xd25   : > { %2879 = dma.vmem_to_hbm [thread:$0]  (%p3108_p5), %s2431_s28, 128, %s2428_s0, %s2417_s1  }
 0xd26 PF: > { %p2885_p13 = scmp.ge.s32.totalorder %s3000_s24, 2  ;;  %s2442_s2 = sand.u32 1, %s2988_s21  }
 0xd27   : > { %s2443_s18 = scalar_lea.sflag [#allocation3], %s2442_s2 }
 0xd28   : > { %p2882_p0 = pnand %p2885_p13, %p3112_p6 }
 0xd2a   : > { %p2883_p1 = pneg %p2882_p0 }
 0xd2c   : > { %2983 = dma.done.wait (%p2883_p1), %s2443_s18, 128  }
 0xd2d   : > { %2985 = vsyncadd (%p2883_p1), %s2443_s18, 4294967168  ;;  %p22_p2 = scmp.ge.s32.totalorder %s3095_s27, 4   ;;  %s3572_s21 = smov %s2992_s22 }
 0xd2e   : > { %s3573_s22 = smov %s2996_s23  ;;  %s3574_s23 = smov %s3106_s30 }
 0xd2f   : > { %s3575_s24 = smov %s3095_s27  ;;  %24 = sbr.rel (!%p22_p2) target bundleno = 7 (0x7), region = 127 }
 0xd34   :  { %2448 = vsyncpa [#allocation3], 1 }
 0xd35   :  { %2450 = vsyncpa [#allocation3 + $0x1], 1 }

</bundles_post_ra>
